<compile_context>
chip_gen: v7x
topology: tpu7x:2x2x1
jax: 0.10.0
libtpu: 0.0.40
codegen_flags: <defaults>
</compile_context>

<pallas_src>
import jax
import jax.numpy as jnp
from jax import lax
from jax.experimental import pallas as pl
from jax.experimental.pallas import tpu as pltpu


def _gelu_exact(x):
    # 0.5 * x * (1 + erf(x / sqrt(2)))  -- exact GELU, matches torch.nn.GELU()
    return 0.5 * x * (1.0 + lax.erf(x * jnp.float32(0.7071067811865476)))


def mlp_kernel(x_ref, w1_ref, w2_ref, w3_ref, vec_ref, o_ref):
    x = x_ref[...].astype(jnp.float32)
    vecs = vec_ref[...].astype(jnp.float32)      # (5, dim): b1,b2,b3,gamma,beta
    b1, b2, b3 = vecs[0:1, :], vecs[1:2, :], vecs[2:3, :]
    gamma, beta = vecs[3:4, :], vecs[4:5, :]

    h = jnp.dot(x, w1_ref[...], preferred_element_type=jnp.float32) + b1
    h = _gelu_exact(h)
    h = jnp.dot(h, w2_ref[...], preferred_element_type=jnp.float32) + b2
    h = _gelu_exact(h)
    h = jnp.dot(h, w3_ref[...], preferred_element_type=jnp.float32) + b3
    h = _gelu_exact(h)

    # LayerNorm over last dim (biased variance, eps = 1e-5)
    mean = jnp.mean(h, axis=-1, keepdims=True)
    cent = h - mean
    var = jnp.mean(cent * cent, axis=-1, keepdims=True)
    inv = lax.rsqrt(var + jnp.float32(1e-5))
    y = cent * inv * gamma + beta

    o_ref[...] = y.astype(o_ref.dtype)


def _round_up(x, m):
    return ((x + m - 1) // m) * m


def _pick_tm(M):
    """Large 8-aligned row tile, capped at 512, aiming for >= 2 grid steps."""
    if M <= 8:
        return 8
    tm = min(512, _round_up((M + 1) // 2, 8))
    return max(8, tm)


def _spec(shape, index_map, buffers=None):
    """BlockSpec with optional explicit buffer count (fallback if API lacks it)."""
    if buffers is None:
        return pl.BlockSpec(shape, index_map)
    try:
        return pl.BlockSpec(shape, index_map, pipeline_mode=pl.Buffered(buffers))
    except TypeError:
        # Older API without pipeline_mode: fall back to default double-buffering.
        return pl.BlockSpec(shape, index_map)


def mlp_forward(x, params, *, tm=None):
    """x: [..., dim]; params: (w1,b1,w2,b2,w3,b3,gamma,beta)."""
    orig_shape = x.shape
    dim = orig_shape[-1]
    x2 = x.reshape(-1, dim)
    M = x2.shape[0]

    if tm is None:
        tm = _pick_tm(M)
    assert tm % 8 == 0, "row tile must be a multiple of 8 (f32 sublanes)"

    # Pad rows to a multiple of the tile; padded rows are cheap and sliced off.
    M_pad = _round_up(M, tm)
    if M_pad != M:
        x2 = jnp.pad(x2, ((0, M_pad - M), (0, 0)))
    grid_m = M_pad // tm

    w1, b1, w2, b2, w3, b3, gamma, beta = params
    # Pack all per-channel vectors into one resident (5, dim) array.
    vecs = jnp.stack([b1, b2, b3, gamma, beta], axis=0)

    row_spec = pl.BlockSpec((tm, dim), lambda i: (i, 0))
    mat_spec = _spec((dim, dim), lambda i: (0, 0), buffers=1)   # resident weights
    vec_spec = _spec((5, dim), lambda i: (0, 0), buffers=1)     # resident vectors

    # VMEM budget: single-buffered weights + vectors, double-buffered x/out
    # tiles, plus headroom for f32 intermediates inside the kernel body.
    weight_bytes = 3 * dim * dim * 4 + 5 * dim * 4
    tile_bytes = 2 * 2 * tm * dim * 4          # x in + out, double-buffered
    interm_bytes = 4 * tm * dim * 4            # h / temporaries headroom
    vmem_needed = weight_bytes + tile_bytes + interm_bytes
    vmem_limit = int(min(max(2 * vmem_needed, 32 << 20), 64 << 20))

    cost = pl.CostEstimate(
        flops=2 * 3 * M_pad * dim * dim,
        transcendentals=3 * M_pad * dim + M_pad,
        bytes_accessed=2 * M_pad * dim * 4 + 3 * dim * dim * 4 + 5 * dim * 4,
    )

    out = pl.pallas_call(
        mlp_kernel,
        out_shape=jax.ShapeDtypeStruct((M_pad, dim), x.dtype),
        grid_spec=pltpu.PrefetchScalarGridSpec(
            num_scalar_prefetch=0,
            grid=(grid_m,),
            in_specs=[row_spec, mat_spec, mat_spec, mat_spec, vec_spec],
            out_specs=row_spec,
        ),
        compiler_params=pltpu.CompilerParams(
            dimension_semantics=("parallel",),
            vmem_limit_bytes=vmem_limit,
        ),
        cost_estimate=cost,
    )(x2, w1, w2, w3, vecs)

    if M_pad != M:
        out = out[:M]
    return out.reshape(orig_shape)


def _reference_forward(x, params):
    w1, b1, w2, b2, w3, b3, gamma, beta = params
    h = x.astype(jnp.float32)

    def gelu(t):
        return 0.5 * t * (1.0 + lax.erf(t / jnp.sqrt(jnp.float32(2.0))))

    h = gelu(h @ w1 + b1)
    h = gelu(h @ w2 + b2)
    h = gelu(h @ w3 + b3)
    mean = jnp.mean(h, axis=-1, keepdims=True)
    var = jnp.mean((h - mean) ** 2, axis=-1, keepdims=True)
    return ((h - mean) * lax.rsqrt(var + 1e-5) * gamma + beta).astype(x.dtype)


def init_params(key, dim):
    ks = jax.random.split(key, 6)
    scale = 1.0 / jnp.sqrt(dim)
    w1 = jax.random.uniform(ks[0], (dim, dim), jnp.float32, -scale, scale)
    b1 = jax.random.uniform(ks[1], (dim,), jnp.float32, -scale, scale)
    w2 = jax.random.uniform(ks[2], (dim, dim), jnp.float32, -scale, scale)
    b2 = jax.random.uniform(ks[3], (dim,), jnp.float32, -scale, scale)
    w3 = jax.random.uniform(ks[4], (dim, dim), jnp.float32, -scale, scale)
    b3 = jax.random.uniform(ks[5], (dim,), jnp.float32, -scale, scale)
    gamma = jnp.ones((dim,), jnp.float32)   # nn.LayerNorm default init
    beta = jnp.zeros((dim,), jnp.float32)
    return (w1, b1, w2, b2, w3, b3, gamma, beta)


if __name__ == "__main__":
    key = jax.random.PRNGKey(0)
    dim = 128          # lane-width-friendly hidden size
    batch, seq = 2, 256  # M = 512 rows -> tm = 256, 2 parallel grid steps

    k_x, k_p = jax.random.split(key)
    x = jax.random.normal(k_x, (batch, seq, dim), jnp.float32)
    params = init_params(k_p, dim)

    out = mlp_forward(x, params)          # default tiling (tm=256, grid=(2,))
    out = jax.block_until_ready(out)

    ref = _reference_forward(x, params)
    assert out.shape == x.shape
    assert jnp.allclose(out, ref, atol=1e-4, rtol=1e-4), "mismatch vs reference"

    print("KERNEL_OK")
</pallas_src>

<mosaic_0001>
module attributes {stable_mosaic.version = 11 : i64} {
  func.func @mlp_kernel(%arg0: i32, %arg1: memref<256x128xf32, #tpu.memory_space<vmem>>, %arg2: memref<128x128xf32, #tpu.memory_space<vmem>>, %arg3: memref<128x128xf32, #tpu.memory_space<vmem>>, %arg4: memref<128x128xf32, #tpu.memory_space<vmem>>, %arg5: memref<5x128xf32, #tpu.memory_space<vmem>>, %arg6: memref<256x128xf32, #tpu.memory_space<vmem>>) attributes {dimension_semantics = [#tpu.dimension_semantics<parallel>], iteration_bounds = array<i64: 2>, scalar_prefetch = 0 : i64, scratch_operands = 0 : i64, tpu.core_type = #tpu.core_type<tc>, window_params = [{transform_indices = @transform_0, window_bounds = array<i64: 256, 128>}, {pipeline_mode = #tpu.pipeline_mode<synchronous>, transform_indices = @transform_1, window_bounds = array<i64: 128, 128>}, {pipeline_mode = #tpu.pipeline_mode<synchronous>, transform_indices = @transform_2, window_bounds = array<i64: 128, 128>}, {pipeline_mode = #tpu.pipeline_mode<synchronous>, transform_indices = @transform_3, window_bounds = array<i64: 128, 128>}, {pipeline_mode = #tpu.pipeline_mode<synchronous>, transform_indices = @transform_4, window_bounds = array<i64: 5, 128>}, {transform_indices = @transform_5, window_bounds = array<i64: 256, 128>}]} {
    %c0 = arith.constant 0 : index
    %c0_0 = arith.constant 0 : index
    %0 = vector.load %arg1[%c0, %c0_0] : memref<256x128xf32, #tpu.memory_space<vmem>>, vector<256x128xf32>
    %c0_1 = arith.constant 0 : index
    %c0_2 = arith.constant 0 : index
    %1 = vector.load %arg5[%c0_1, %c0_2] : memref<5x128xf32, #tpu.memory_space<vmem>>, vector<5x128xf32>
    %2 = vector.extract_strided_slice %1 {offsets = [0, 0], sizes = [1, 128], strides = [1, 1]} : vector<5x128xf32> to vector<1x128xf32>
    %3 = vector.extract_strided_slice %1 {offsets = [1, 0], sizes = [1, 128], strides = [1, 1]} : vector<5x128xf32> to vector<1x128xf32>
    %4 = vector.extract_strided_slice %1 {offsets = [2, 0], sizes = [1, 128], strides = [1, 1]} : vector<5x128xf32> to vector<1x128xf32>
    %5 = vector.extract_strided_slice %1 {offsets = [3, 0], sizes = [1, 128], strides = [1, 1]} : vector<5x128xf32> to vector<1x128xf32>
    %6 = vector.extract_strided_slice %1 {offsets = [4, 0], sizes = [1, 128], strides = [1, 1]} : vector<5x128xf32> to vector<1x128xf32>
    %c0_3 = arith.constant 0 : index
    %c0_4 = arith.constant 0 : index
    %7 = vector.load %arg2[%c0_3, %c0_4] : memref<128x128xf32, #tpu.memory_space<vmem>>, vector<128x128xf32>
    %cst = arith.constant dense<0.000000e+00> : vector<256x128xf32>
    %8 = tpu.matmul %0, %7, %cst {dimension_numbers = #tpu.dot_dimension_numbers<[1], [0], [0], [1], [0, 0, 1, 1], [], []>} : vector<256x128xf32>, vector<128x128xf32>, vector<256x128xf32> -> vector<256x128xf32>
    %9 = vector.broadcast %2 : vector<1x128xf32> to vector<256x128xf32>
    %10 = arith.addf %8, %9 : vector<256x128xf32>
    %cst_5 = arith.constant 5.000000e-01 : f32
    %11 = vector.broadcast %cst_5 : f32 to vector<256x128xf32>
    %12 = arith.mulf %11, %10 : vector<256x128xf32>
    %cst_6 = arith.constant 0.707106769 : f32
    %13 = vector.broadcast %cst_6 : f32 to vector<256x128xf32>
    %14 = arith.mulf %10, %13 : vector<256x128xf32>
    %15 = math.erf %14 : vector<256x128xf32>
    %cst_7 = arith.constant 1.000000e+00 : f32
    %16 = vector.broadcast %cst_7 : f32 to vector<256x128xf32>
    %17 = arith.addf %16, %15 : vector<256x128xf32>
    %18 = arith.mulf %12, %17 : vector<256x128xf32>
    %c0_8 = arith.constant 0 : index
    %c0_9 = arith.constant 0 : index
    %19 = vector.load %arg3[%c0_8, %c0_9] : memref<128x128xf32, #tpu.memory_space<vmem>>, vector<128x128xf32>
    %cst_10 = arith.constant dense<0.000000e+00> : vector<256x128xf32>
    %20 = tpu.matmul %18, %19, %cst_10 {dimension_numbers = #tpu.dot_dimension_numbers<[1], [0], [0], [1], [0, 0, 1, 1], [], []>} : vector<256x128xf32>, vector<128x128xf32>, vector<256x128xf32> -> vector<256x128xf32>
    %21 = vector.broadcast %3 : vector<1x128xf32> to vector<256x128xf32>
    %22 = arith.addf %20, %21 : vector<256x128xf32>
    %cst_11 = arith.constant 5.000000e-01 : f32
    %23 = vector.broadcast %cst_11 : f32 to vector<256x128xf32>
    %24 = arith.mulf %23, %22 : vector<256x128xf32>
    %cst_12 = arith.constant 0.707106769 : f32
    %25 = vector.broadcast %cst_12 : f32 to vector<256x128xf32>
    %26 = arith.mulf %22, %25 : vector<256x128xf32>
    %27 = math.erf %26 : vector<256x128xf32>
    %cst_13 = arith.constant 1.000000e+00 : f32
    %28 = vector.broadcast %cst_13 : f32 to vector<256x128xf32>
    %29 = arith.addf %28, %27 : vector<256x128xf32>
    %30 = arith.mulf %24, %29 : vector<256x128xf32>
    %c0_14 = arith.constant 0 : index
    %c0_15 = arith.constant 0 : index
    %31 = vector.load %arg4[%c0_14, %c0_15] : memref<128x128xf32, #tpu.memory_space<vmem>>, vector<128x128xf32>
    %cst_16 = arith.constant dense<0.000000e+00> : vector<256x128xf32>
    %32 = tpu.matmul %30, %31, %cst_16 {dimension_numbers = #tpu.dot_dimension_numbers<[1], [0], [0], [1], [0, 0, 1, 1], [], []>} : vector<256x128xf32>, vector<128x128xf32>, vector<256x128xf32> -> vector<256x128xf32>
    %33 = vector.broadcast %4 : vector<1x128xf32> to vector<256x128xf32>
    %34 = arith.addf %32, %33 : vector<256x128xf32>
    %cst_17 = arith.constant 5.000000e-01 : f32
    %35 = vector.broadcast %cst_17 : f32 to vector<256x128xf32>
    %36 = arith.mulf %35, %34 : vector<256x128xf32>
    %cst_18 = arith.constant 0.707106769 : f32
    %37 = vector.broadcast %cst_18 : f32 to vector<256x128xf32>
    %38 = arith.mulf %34, %37 : vector<256x128xf32>
    %39 = math.erf %38 : vector<256x128xf32>
    %cst_19 = arith.constant 1.000000e+00 : f32
    %40 = vector.broadcast %cst_19 : f32 to vector<256x128xf32>
    %41 = arith.addf %40, %39 : vector<256x128xf32>
    %42 = arith.mulf %36, %41 : vector<256x128xf32>
    %cst_20 = arith.constant dense<0.000000e+00> : vector<256xf32>
    %43 = vector.multi_reduction <add>, %42, %cst_20 [1] : vector<256x128xf32> to vector<256xf32>
    %44 = vector.shape_cast %43 : vector<256xf32> to vector<256x1xf32>
    %cst_21 = arith.constant 1.280000e+02 : f32
    %45 = vector.broadcast %cst_21 : f32 to vector<256x1xf32>
    %46 = arith.divf %44, %45 : vector<256x1xf32>
    %47 = vector.broadcast %46 : vector<256x1xf32> to vector<256x128xf32>
    %48 = arith.subf %42, %47 : vector<256x128xf32>
    %49 = arith.mulf %48, %48 : vector<256x128xf32>
    %cst_22 = arith.constant dense<0.000000e+00> : vector<256xf32>
    %50 = vector.multi_reduction <add>, %49, %cst_22 [1] : vector<256x128xf32> to vector<256xf32>
    %51 = vector.shape_cast %50 : vector<256xf32> to vector<256x1xf32>
    %cst_23 = arith.constant 1.280000e+02 : f32
    %52 = vector.broadcast %cst_23 : f32 to vector<256x1xf32>
    %53 = arith.divf %51, %52 : vector<256x1xf32>
    %cst_24 = arith.constant 9.99999974E-6 : f32
    %54 = vector.broadcast %cst_24 : f32 to vector<256x1xf32>
    %55 = arith.addf %53, %54 : vector<256x1xf32>
    %56 = math.rsqrt %55 : vector<256x1xf32>
    %57 = vector.broadcast %56 : vector<256x1xf32> to vector<256x128xf32>
    %58 = arith.mulf %48, %57 : vector<256x128xf32>
    %59 = vector.broadcast %5 : vector<1x128xf32> to vector<256x128xf32>
    %60 = arith.mulf %58, %59 : vector<256x128xf32>
    %61 = vector.broadcast %6 : vector<1x128xf32> to vector<256x128xf32>
    %62 = arith.addf %60, %61 : vector<256x128xf32>
    %c0_25 = arith.constant 0 : index
    %c0_26 = arith.constant 0 : index
    %63 = vector.load %arg6[%c0_25, %c0_26] : memref<256x128xf32, #tpu.memory_space<vmem>>, vector<256x128xf32>
    tpu.vector_store %arg6[%c0_25, %c0_26], %62 {strides = array<i32>} : memref<256x128xf32, #tpu.memory_space<vmem>>, vector<256x128xf32>,
    return
  }
  func.func @transform_0(%arg0: i32) -> (i32, i32) {
    %c0_i32 = arith.constant 0 : i32
    %c0_i32_0 = arith.constant 0 : i32
    return %arg0, %c0_i32 : i32, i32
  }
  func.func @transform_1(%arg0: i32) -> (i32, i32) {
    %c0_i32 = arith.constant 0 : i32
    %c0_i32_0 = arith.constant 0 : i32
    %c0_i32_1 = arith.constant 0 : i32
    return %c0_i32, %c0_i32_0 : i32, i32
  }
  func.func @transform_2(%arg0: i32) -> (i32, i32) {
    %c0_i32 = arith.constant 0 : i32
    %c0_i32_0 = arith.constant 0 : i32
    %c0_i32_1 = arith.constant 0 : i32
    return %c0_i32, %c0_i32_0 : i32, i32
  }
  func.func @transform_3(%arg0: i32) -> (i32, i32) {
    %c0_i32 = arith.constant 0 : i32
    %c0_i32_0 = arith.constant 0 : i32
    %c0_i32_1 = arith.constant 0 : i32
    return %c0_i32, %c0_i32_0 : i32, i32
  }
  func.func @transform_4(%arg0: i32) -> (i32, i32) {
    %c0_i32 = arith.constant 0 : i32
    %c0_i32_0 = arith.constant 0 : i32
    %c0_i32_1 = arith.constant 0 : i32
    return %c0_i32, %c0_i32_0 : i32, i32
  }
  func.func @transform_5(%arg0: i32) -> (i32, i32) {
    %c0_i32 = arith.constant 0 : i32
    %c0_i32_0 = arith.constant 0 : i32
    return %arg0, %c0_i32 : i32, i32
  }
}

</mosaic_0001>

<bundles_post_ra>
// kernel: tpu_custom_call.1
= control target key start
LH: loop header
LB: loop body
LE: loop exit
PB: predicated region body
PF: predicated region fallthrough
CT: control target
= control target key end

     0   :  { %10 = vsyncpa [#allocation3], 0  ;;  %s4320_s0 = inlined_call_operand.hbm [shape: f32[512,128], index: 0, kind: input, shape index: {}]   ;;  %s4321_s1 = inlined_call_operand.hbm [shape: f32[128,128], index: 1, kind: input, shape index: {}]   ;;  %s4322_s2 = inlined_call_operand.hbm [shape: f32[128,128], index: 2, kind: input, shape index: {}]   ;;  %s4323_s3 = inlined_call_operand.hbm [shape: f32[128,128], index: 3, kind: input, shape index: {}]   ;;  %s4324_s4 = inlined_call_operand.vmem [shape: f32[5,128], index: 4, kind: input, shape index: {}]   ;;  %s4325_s5 = inlined_call_operand.hbm [shape: f32[512,128], index: 5, kind: output, shape index: {}]  }
   0x1   :  { %12 = vsyncpa [#allocation3 + $0x1], 0 }
   0x2   :  { %13 = vsyncpa [#allocation6], 0 }
   0x3   :  { %14 = vsyncpa [#allocation9], 0 }
   0x4   :  { %15 = vsyncpa [#allocation4], 0 }
   0x5   :  { %17 = vsyncpa [#allocation4 + $0x1], 0  ;;  %s3195_s18 = smov 0   ;;  %s3197_s19 = smov 0  }
   0x6   :  { %s3199_s20 = smov 0   ;;  %s3201_s21 = smov 0  }
   0x7 LB: > { %s3216_s22 = sadd.s32 4294967295, %s3154_s21   ;;  %s2110_s23 = sadd.s32 4294967294, %s3154_s21   ;;  %s3154_s21 = sphi %s3201_s21, %s4348_s21   ;;  %s3150_s20 = sphi %s3199_s20, %s4347_s20   ;;  %s3146_s19 = sphi %s3197_s19, %s4346_s19   ;;  %s3142_s18 = sphi %s3195_s18, %s4345_s18  }
   0x8   : > { %p43_p0 = scmp.ne.s32.totalorder %s3146_s19, %s3142_s18  ;;  %p4326_p1 = scmp.eq.s32.totalorder %s3216_s22, 0 }
   0x9   : > { %p157_p3 = scmp.eq.s32.totalorder %s2110_s23, 1  ;;  %p2111_p5 = scmp.ge.s32.totalorder %s3154_s21, 1 }
   0xa   : > { %p3225_p4 = por %p4326_p1, %p43_p0  ;;  %p164_p7 = scmp.lt.s32.totalorder %s3154_s21, 3 }
   0xb   : > { %p3230_p6 = por %p157_p3, %p43_p0  ;;  %s3156_s27 = smov [#allocation5]  }
   0xc   : > { %s4329_s24 = scalar_select %p3225_p4, 1, 0 }
   0xd   : > { %s4330_s25 = scalar_select %p3230_p6, 1, 0 }
   0xe   : > { %p3235_p8 = pnand %p2111_p5, %p164_p7  ;;  %s176_s28 = sshll.u32 %s3156_s27, 4  ;;  %s3239_s28 = int_to_ptr.vmem [resolvable:$true] %s176_s28 }
   0xf   : > { %s3157_s30 = smov [#allocation7]   ;;  %s3158_s7 = smov [#allocation8]  }
  0x10   : > { %s4331_s26 = scalar_select %p3235_p8, 1, 0 }
  0x11   : > { %p2644_p9 = pneg %p3235_p8  ;;  %s189_s6 = sshll.u32 %s3157_s30, 4  ;;  %s3250_s6 = int_to_ptr.vmem [resolvable:$true] %s189_s6 }
  0x12   : > { %s3252_s8 = sshll.u32 %s3158_s7, 4  ;;  %s2966_s11 = scalar_lea.hbm %s4321_s1, 2048  ;;  %s203_s8 = int_to_ptr.vmem [resolvable:$true] %s3252_s8 }
  0x13   : > { %p3246_p11 = pnand %p2644_p9, %p4326_p1  ;;  %p2967_p12 = scmp.ne.s32.totalorder %s4321_s1, %s2966_s11 }
  0x14   : > { %p2973_p5 = scmp.lt.u32.totalorder %s2966_s11, %s4321_s1 }
  0x15   : > { %p3262_p13 = pneg %p3246_p11 }
  0x17   : > { %p2969_p0 = pnand %p3262_p13, %p2967_p12 }
  0x19   : > { %p2970_p3 = pneg %p2969_p0 }
  0x1b   : > { %p2975_p7 = pnand %p2973_p5, %p2970_p3 }
  0x1d   : > { %2978 = shalt.err (!%p2975_p7)
}
  0x1e   : > { %s2979_s17 = scalar_lea.vmem %s3239_s28, 2048  ;;  %p2987_p2 = scmp.lt.s32.totalorder %s3239_s28, %s3239_s28 }
  0x1f   : > { %p2980_p9 = scmp.ne.s32.totalorder %s3239_s28, %s2979_s17  ;;  %p2988_p6 = scmp.lt.s32.totalorder %s2979_s17, %s2979_s17 }
  0x21   : > { %p2982_p10 = pnand %p2980_p9, %p3262_p13  ;;  %p2989_p12 = por %p2988_p6, %p2987_p2 }
  0x23   : > { %p2983_p1 = pneg %p2982_p10 }
  0x25   : > { %p2990_p0 = pnand %p2989_p12, %p2983_p1 }
  0x27   : > { %2993 = shalt.err (!%p2990_p0)
}
  0x28   : > { %s3159_s23 = smov 128   ;;  %s3160_s27 = smov 8  }
  0x29   : > { %2647 = dma.hbm_to_vmem [thread:$0]  (!%p3246_p11), %s4321_s1, 2048, %s3239_s28, [#allocation6], %s3159_s23, %s3159_s23, %s3160_s27  }
  0x2a   : > { %s2994_s11 = scalar_lea.hbm %s4322_s2, 2048 }
  0x2b   : > { %p2995_p1 = scmp.ne.s32.totalorder %s4322_s2, %s2994_s11  ;;  %p3001_p10 = scmp.lt.u32.totalorder %s2994_s11, %s4322_s2 }
  0x2d   : > { %p2997_p2 = pnand %p2995_p1, %p3262_p13 }
  0x2f   : > { %p2998_p6 = pneg %p2997_p2 }
  0x31   : > { %p3003_p3 = pnand %p3001_p10, %p2998_p6 }
  0x33   : > { %3006 = shalt.err (!%p3003_p3)
}
  0x34   : > { %s3007_s28 = scalar_lea.vmem %s3250_s6, 2048  ;;  %p3015_p12 = scmp.lt.s32.totalorder %s3250_s6, %s3250_s6 }
  0x35   : > { %p3008_p5 = scmp.ne.s32.totalorder %s3250_s6, %s3007_s28  ;;  %p3016_p0 = scmp.lt.s32.totalorder %s3007_s28, %s3007_s28 }
  0x37   : > { %p3010_p7 = pnand %p3008_p5, %p3262_p13  ;;  %p3017_p1 = por %p3016_p0, %p3015_p12 }
  0x39   : > { %p3011_p9 = pneg %p3010_p7 }
  0x3b   : > { %p3018_p2 = pnand %p3017_p1, %p3011_p9 }
  0x3d   : > { %3021 = shalt.err (!%p3018_p2)
}
  0x3e   : > { %2650 = dma.hbm_to_vmem [thread:$0]  (!%p3246_p11), %s4322_s2, 2048, %s3250_s6, [#allocation6], %s3159_s23, %s3159_s23, %s3160_s27  }
  0x3f   : > { %s3022_s10 = scalar_lea.hbm %s4323_s3, 2048 }
  0x40   : > { %p3023_p6 = scmp.ne.s32.totalorder %s4323_s3, %s3022_s10  ;;  %p3029_p5 = scmp.lt.u32.totalorder %s3022_s10, %s4323_s3 }
  0x42   : > { %p3025_p10 = pnand %p3023_p6, %p3262_p13 }
  0x44   : > { %p3026_p3 = pneg %p3025_p10 }
  0x46   : > { %p3031_p7 = pnand %p3029_p5, %p3026_p3 }
  0x48   : > { %3034 = shalt.err (!%p3031_p7)
}
  0x49   : > { %s3035_s16 = scalar_lea.vmem %s203_s8, 2048  ;;  %p3043_p1 = scmp.lt.s32.totalorder %s203_s8, %s203_s8 }
  0x4a   : > { %p3036_p9 = scmp.ne.s32.totalorder %s203_s8, %s3035_s16  ;;  %p3044_p2 = scmp.lt.s32.totalorder %s3035_s16, %s3035_s16 }
  0x4c   : > { %p3038_p12 = pnand %p3036_p9, %p3262_p13  ;;  %p3045_p4 = por %p3044_p2, %p3043_p1 }
  0x4e   : > { %p3039_p0 = pneg %p3038_p12 }
  0x50   : > { %p3046_p8 = pnand %p3045_p4, %p3039_p0 }
  0x52   : > { %3049 = shalt.err (!%p3046_p8)
}
  0x53   : > { %2653 = dma.hbm_to_vmem [thread:$0]  (!%p3246_p11), %s4323_s3, 2048, %s203_s8, [#allocation9], %s3159_s23, %s3159_s23, %s3160_s27  }
  0x54   : > { %s3335_s14 = sadd.s32 1, %s3154_s21   ;;  %s30_s17 = sadd.s32 1, %s3150_s20 }
  0x55   : > { %s27_s29 = ssub.s32 %s3154_s21, %s3335_s14  ;;  %p37_p8 = scmp.ne.s32.totalorder %s3150_s20, %s3146_s19 }
  0x56   : > { %p28_p4 = scmp.eq.s32.totalorder %s27_s29, 0  ;;  %p38_p13 = scmp.eq.s32.totalorder %s3154_s21, 0 }
  0x57   : > { %p2665_p6 = scmp.lt.s32.totalorder %s3154_s21, 2  ;;  %p4334_p3 = scmp.eq.s32.totalorder %s3216_s22, 1 }
  0x58   : > { %s3345_s30 = scalar_select %p28_p4, %s3150_s20, %s30_s17  }
  0x59   : > { %p39_p10 = por %p38_p13, %p37_p8  ;;  %p3349_p5 = por %p4334_p3, %p37_p8 }
  0x5a   : > { %s219_s9 = sand.u32 1, %s3150_s20   ;;  %s2130_s10 = sshll.u32 %s3154_s21, 12 }
  0x5b   : > { %s2116_s8 = sshll.u32 %s219_s9, 8  ;;  %s3358_s13 = scalar_lea.hbm %s4320_s0, %s2130_s10 }
  0x5c   : > { %s223_s15 = scalar_lea.vmem [#allocation2], %s2116_s8  ;;  %p3360_p11 = pnand %p2665_p6, %p39_p10 }
  0x5d   : > { %s230_s16 = sshll.u32 %s223_s15, 4  ;;  %s3366_s28 = scalar_lea.sflag [#allocation3], %s219_s9  ;;  %s3364_s16 = int_to_ptr.vmem [resolvable:$true] %s230_s16 }
  0x5e   : > { %s3050_s29 = scalar_lea.hbm %s3358_s13, 4096  ;;  %p3052_p9 = pneg %p3360_p11 }
  0x5f   : > { %p3051_p7 = scmp.ne.s32.totalorder %s3358_s13, %s3050_s29  ;;  %s3055_s8 = scalar_lea.hbm %s4320_s0, 8192 }
  0x60   : > { %p3056_p1 = scmp.lt.u32.totalorder %s3358_s13, %s4320_s0  ;;  %p3057_p2 = scmp.lt.u32.totalorder %s3055_s8, %s3050_s29 }
  0x61   : > { %p3053_p12 = pnand %p3052_p9, %p3051_p7  ;;  %p3059_p8 = scmp.lt.u32.totalorder %s3050_s29, %s3358_s13 }
  0x62   : > { %p3058_p4 = por %p3057_p2, %p3056_p1 }
  0x63   : > { %p3054_p0 = pneg %p3053_p12 }
  0x64   : > { %p3060_p13 = por %p3059_p8, %p3058_p4 }
  0x66   : > { %p3061_p6 = pnand %p3060_p13, %p3054_p0 }
  0x68   : > { %3064 = shalt.err (!%p3061_p6)
}
  0x69   : > { %s3065_s9 = scalar_lea.vmem %s3364_s16, 4096  ;;  %s3161_s15 = smov [#allocation2]  }
  0x6a   : > { %p3066_p10 = scmp.ne.s32.totalorder %s3364_s16, %s3065_s9  ;;  %s3070_s17 = sshll.u32 %s3161_s15, 4  ;;  %s3071_s17 = int_to_ptr.vmem [resolvable:$false] %s3070_s17 }
  0x6b   : > { %s3072_s10 = scalar_lea.vmem %s3071_s17, 8192  ;;  %p3073_p12 = scmp.lt.s32.totalorder %s3364_s16, %s3071_s17 }
  0x6c   : > { %p3068_p3 = pnand %p3066_p10, %p3052_p9  ;;  %p3074_p1 = scmp.lt.s32.totalorder %s3072_s10, %s3065_s9 }
  0x6e   : > { %p3069_p7 = pneg %p3068_p3  ;;  %p3075_p2 = por %p3074_p1, %p3073_p12 }
  0x70   : > { %p3076_p4 = pnand %p3075_p2, %p3069_p7 }
  0x72   : > { %3079 = shalt.err (!%p3076_p4)
}
  0x73   : > { %2657 = dma.hbm_to_vmem [thread:$0]  (!%p3360_p11), %s3358_s13, 4096, %s3364_s16, %s3366_s28, %s3159_s23, %s3159_s23, %s3160_s27  }
  0x74   : > { %p4337_p9 = scmp.ne.s32.totalorder %s4331_s26, 0 }
  0x75   : > { %s3400_s29 = sand.u32 (!%p4337_p9), 1, %s3146_s19   ;;  %p4338_p0 = scmp.ne.s32.totalorder (!%p4337_p9), %s4329_s24, 0 }
  0x76   : > { %242 = sbr.rel (%p4337_p9) target bundleno = 1256 (0x4e8), region = 40  ;;  %s2120_s8 = sshll.u32 (!%p4337_p9), %s3400_s29, 8 }
  0x77   : > { %s245_s11 = scalar_lea.sflag (!%p4337_p9), [#allocation3], %s3400_s29  ;;  %s3406_s6 = scalar_lea.vmem (!%p4337_p9), [#allocation2], %s2120_s8 }
  0x7d   : > { %3125 = dma.done.wait (%p4338_p0), %s245_s11, 4096  }
  0x7e   : > { %3127 = vsyncadd (%p4338_p0), %s245_s11, 4294963200  ;;  %p4339_p11 = scmp.eq.s32.totalorder %s3216_s22, 0 }
  0x80   : > { %3129 = dma.done.wait (%p4339_p11), [#allocation6], 4096   ;;  %p4340_p8 = pmov %p4339_p11 }
  0x82   : > { %3131 = vsyncadd (%p4340_p8), [#allocation6], 4294963200  ;;  %p4341_p13 = pmov %p4340_p8 }
  0x83   : > { %p4342_p6 = pmov %p4340_p8 }
  0x84   : > { %3133 = dma.done.wait (%p4341_p13), [#allocation9], 2048  }
  0x85   : > { %3135 = vsyncadd (%p4342_p6), [#allocation9], 4294965248  ;;  %v322_v0 = vld [vmem:[#allocation5] sm:$0xff]  ;;  %v323_v1 = vld [vmem:[#allocation5 + $0x8] sm:$0xff]  ;;  %s4144_s13 = scalar_lea.vmem [#allocation10], %s2120_s8  ;;  %s2131_s16 = sshll.u32 %s3216_s22, 12 }
  0x86   : > { %v324_v2 = vld [vmem:[#allocation5 + $0x10] sm:$0xff]  ;;  %v2516_v3 = vpack.c.bf16 %v323_v1, %v322_v0  ;;  %v325_v4 = vld [vmem:[#allocation5 + $0x18] sm:$0xff]  ;;  %v326_v6 = vld [vmem:[#allocation5 + $0x20] sm:$0xff]  ;;  %s2008_s28 = sshll.u32 %s4144_s13, 4  ;;  %s4271_s15 = scalar_lea.hbm %s4325_s5, %s2131_s16  ;;  %s4273_s28 = int_to_ptr.vmem [resolvable:$true] %s2008_s28 }
  0x87   : > { %v2520_v5 = vpack.c.bf16 %v325_v4, %v324_v2  ;;  %v327_v7 = vld [vmem:[#allocation5 + $0x28] sm:$0xff]  ;;  %v289_v9 = vld [vmem:[%s3406_s6] sm:$0xff]  ;;  %v328_v10 = vld [vmem:[#allocation5 + $0x30] sm:$0xff]  ;;  %s1995_s22 = scalar_lea.sflag [#allocation4], %s3400_s29  ;;  %s3080_s17 = scalar_lea.vmem %s4273_s28, 4096 }
  0x88   : > { %2517 = vmatprep.subr.bf16.mxu0 %v2516_v3  ;;  %2612 = vmatprep.subr.bf16.mxu1 %v2516_v3  ;;  %v2524_v8 = vpack.c.bf16 %v327_v7, %v326_v6  ;;  %v329_v11 = vld [vmem:[#allocation5 + $0x38] sm:$0xff]  ;;  %v305_v13 = vld [vmem:[%s3406_s6 + $0x80] sm:$0xff]  ;;  %v331_v15 = vld [vmem:[#allocation5 + $0x48] sm:$0xff]  ;;  %p3081_p10 = scmp.ne.s32.totalorder %s4273_s28, %s3080_s17  ;;  %s3162_s10 = smov [#allocation10]  }
  0x89   : > { %2519 = vmatpush3.bf16.msra.mxu0 %v2516_v3  ;;  %2620 = vmatpush3.bf16.msra.mxu1 %v2516_v3  ;;  %v2528_v12 = vpack.c.bf16 %v329_v11, %v328_v10  ;;  %v330_v14 = vld [vmem:[#allocation5 + $0x40] sm:$0xff]  ;;  %v332_v17 = vld [vmem:[#allocation5 + $0x50] sm:$0xff]  ;;  %v333_v18 = vld [vmem:[#allocation5 + $0x58] sm:$0xff]  ;;  %s3084_s8 = sshll.u32 %s3162_s10, 4  ;;  %s3085_s8 = int_to_ptr.vmem [resolvable:$false] %s3084_s8 }
  0x8a   : > { %2521 = vmatprep.subr.bf16.mxu0 %v2520_v5  ;;  %2613 = vmatprep.subr.bf16.mxu1 %v2520_v5  ;;  %v2532_v16 = vpack.c.bf16 %v331_v15, %v330_v14  ;;  %v2536_v19 = vpack.c.bf16 %v333_v18, %v332_v17  ;;  %v334_v20 = vld [vmem:[#allocation5 + $0x60] sm:$0xff]  ;;  %v335_v21 = vld [vmem:[#allocation5 + $0x68] sm:$0xff]  ;;  %v336_v23 = vld [vmem:[#allocation5 + $0x70] sm:$0xff]  ;;  %p3082_p3 = pnand %p3081_p10, %p3349_p5  ;;  %s3086_s11 = scalar_lea.vmem %s3085_s8, 8192 }
  0x8b   : > { %2308 = vmatprep.mubr.f32.mxu0 %v289_v9  ;;  %2332 = vmatprep.mubr.f32.mxu1 %v305_v13  ;;  %v2540_v22 = vpack.c.bf16 %v335_v21, %v334_v20  ;;  %v337_v24 = vld [vmem:[#allocation5 + $0x78] sm:$0xff]  ;;  %v727_v26 = vld [vmem:[#allocation7] sm:$0xff]  ;;  %v728_v27 = vld [vmem:[#allocation7 + $0x8] sm:$0xff]  ;;  %p3087_p12 = scmp.lt.s32.totalorder %s4273_s28, %s3085_s8  ;;  %p3088_p1 = scmp.lt.s32.totalorder %s3086_s11, %s3080_s17 }
  0x8c   : > { %v2544_v25 = vpack.c.bf16 %v337_v24, %v336_v23  ;;  %v2548_v28 = vpack.c.bf16 %v728_v27, %v727_v26  ;;  %v729_v29 = vld [vmem:[#allocation7 + $0x10] sm:$0xff]  ;;  %v730_v30 = vld [vmem:[#allocation7 + $0x18] sm:$0xff]  ;;  %v290_v31 = vld [vmem:[%s3406_s6 + $0x8] sm:$0xff]  ;;  %p3083_p7 = pneg %p3082_p3 }
  0x8d   : > { %2523 = vmatpush3.bf16.msra.mxu0 %v2520_v5  ;;  %2621 = vmatpush3.bf16.msra.mxu1 %v2520_v5  ;;  %v306_v32 = vld [vmem:[%s3406_s6 + $0x88] sm:$0xff]  ;;  %v291_v33 = vld [vmem:[%s3406_s6 + $0x10] sm:$0xff]  ;;  %v2552_v35 = vpack.c.bf16 %v730_v30, %v729_v29  ;;  %v731_v36 = vld [vmem:[#allocation7 + $0x20] sm:$0xff]  ;;  %p3089_p2 = por %p3088_p1, %p3087_p12 }
  0x8e   : > { %2525 = vmatprep.subr.bf16.mxu0 %v2524_v8  ;;  %2614 = vmatprep.subr.bf16.mxu1 %v2524_v8  ;;  %v307_v34 = vld [vmem:[%s3406_s6 + $0x90] sm:$0xff]  ;;  %v732_v37 = vld [vmem:[#allocation7 + $0x28] sm:$0xff]  ;;  %v292_v38 = vld [vmem:[%s3406_s6 + $0x18] sm:$0xff] }
  0x8f   : > { %v308_v39 = vld [vmem:[%s3406_s6 + $0x98] sm:$0xff]  ;;  %v293_v40 = vld [vmem:[%s3406_s6 + $0x20] sm:$0xff]  ;;  %v2556_v42 = vpack.c.bf16 %v732_v37, %v731_v36  ;;  %v294_v43 = vld [vmem:[%s3406_s6 + $0x28] sm:$0xff]  ;;  %p3090_p4 = pnand %p3089_p2, %p3083_p7 }
  0x90   : > { %v309_v41 = vld [vmem:[%s3406_s6 + $0xa0] sm:$0xff]  ;;  %v310_v44 = vld [vmem:[%s3406_s6 + $0xa8] sm:$0xff]  ;;  %v295_v45 = vld [vmem:[%s3406_s6 + $0x30] sm:$0xff] }
  0x91   : > { %2527 = vmatpush3.bf16.msra.mxu0 %v2524_v8  ;;  %2622 = vmatpush3.bf16.msra.mxu1 %v2524_v8  ;;  %v311_v46 = vld [vmem:[%s3406_s6 + $0xb0] sm:$0xff]  ;;  %v296_v47 = vld [vmem:[%s3406_s6 + $0x38] sm:$0xff]  ;;  %v297_v49 = vld [vmem:[%s3406_s6 + $0x40] sm:$0xff] }
  0x92   : > { %2529 = vmatprep.subr.bf16.mxu0 %v2528_v12  ;;  %2615 = vmatprep.subr.bf16.mxu1 %v2528_v12  ;;  %v312_v48 = vld [vmem:[%s3406_s6 + $0xb8] sm:$0xff]  ;;  %v313_v50 = vld [vmem:[%s3406_s6 + $0xc0] sm:$0xff]  ;;  %v298_v51 = vld [vmem:[%s3406_s6 + $0x48] sm:$0xff] }
  0x93   : > { %v314_v52 = vld [vmem:[%s3406_s6 + $0xc8] sm:$0xff]  ;;  %v299_v53 = vld [vmem:[%s3406_s6 + $0x50] sm:$0xff]  ;;  %v300_v55 = vld [vmem:[%s3406_s6 + $0x58] sm:$0xff] }
  0x94   : > { %v315_v54 = vld [vmem:[%s3406_s6 + $0xd0] sm:$0xff]  ;;  %v316_v56 = vld [vmem:[%s3406_s6 + $0xd8] sm:$0xff]  ;;  %v301_v57 = vld [vmem:[%s3406_s6 + $0x60] sm:$0xff] }
  0x95   : > { %2531 = vmatpush3.bf16.msra.mxu0 %v2528_v12  ;;  %2623 = vmatpush3.bf16.msra.mxu1 %v2528_v12  ;;  %v317_v58 = vld [vmem:[%s3406_s6 + $0xe0] sm:$0xff]  ;;  %v302_v59 = vld [vmem:[%s3406_s6 + $0x68] sm:$0xff]  ;;  %v303_v61 = vld [vmem:[%s3406_s6 + $0x70] sm:$0xff] }
  0x96   : > { %2533 = vmatprep.subr.bf16.mxu0 %v2532_v16  ;;  %2616 = vmatprep.subr.bf16.mxu1 %v2532_v16  ;;  %v318_v60 = vld [vmem:[%s3406_s6 + $0xe8] sm:$0xff]  ;;  %v319_v62 = vld [vmem:[%s3406_s6 + $0xf0] sm:$0xff]  ;;  %v304_v63 = vld [vmem:[%s3406_s6 + $0x78] sm:$0xff] }
  0x97   : > { %v320_v0 = vld [vmem:[%s3406_s6 + $0xf8] sm:$0xff]  ;;  %v733_v1 = vld [vmem:[#allocation7 + $0x30] sm:$0xff]  ;;  %v735_v4 = vld [vmem:[#allocation7 + $0x40] sm:$0xff] }
  0x98   : > { %v734_v2 = vld [vmem:[#allocation7 + $0x38] sm:$0xff]  ;;  %v736_v5 = vld [vmem:[#allocation7 + $0x48] sm:$0xff]  ;;  %v737_v7 = vld [vmem:[#allocation7 + $0x50] sm:$0xff] }
  0x99   : > { %2535 = vmatpush3.bf16.msra.mxu0 %v2532_v16  ;;  %2624 = vmatpush3.bf16.msra.mxu1 %v2532_v16  ;;  %v2560_v3 = vpack.c.bf16 %v734_v2, %v733_v1  ;;  %v2564_v6 = vpack.c.bf16 %v736_v5, %v735_v4  ;;  %v738_v8 = vld [vmem:[#allocation7 + $0x58] sm:$0xff]  ;;  %v739_v10 = vld [vmem:[#allocation7 + $0x60] sm:$0xff]  ;;  %v740_v11 = vld [vmem:[#allocation7 + $0x68] sm:$0xff] }
  0x9a   : > { %2537 = vmatprep.subr.bf16.mxu0 %v2536_v19  ;;  %2617 = vmatprep.subr.bf16.mxu1 %v2536_v19  ;;  %v2568_v9 = vpack.c.bf16 %v738_v8, %v737_v7  ;;  %v2572_v12 = vpack.c.bf16 %v740_v11, %v739_v10  ;;  %v741_v13 = vld [vmem:[#allocation7 + $0x70] sm:$0xff]  ;;  %v742_v14 = vld [vmem:[#allocation7 + $0x78] sm:$0xff]  ;;  %v1132_v16 = vld [vmem:[#allocation8] sm:$0xff] }
  0x9b   : > { %v2576_v15 = vpack.c.bf16 %v742_v14, %v741_v13  ;;  %v1133_v17 = vld [vmem:[#allocation8 + $0x8] sm:$0xff]  ;;  %v1134_v18 = vld [vmem:[#allocation8 + $0x10] sm:$0xff]  ;;  %v1135_v20 = vld [vmem:[#allocation8 + $0x18] sm:$0xff] }
  0x9c   : > { %v2584_v21 = vpack.c.bf16 %v1135_v20, %v1134_v18  ;;  %v1137_v23 = vld [vmem:[#allocation8 + $0x28] sm:$0xff] }
  0x9d   : > { %2539 = vmatpush3.bf16.msra.mxu0 %v2536_v19  ;;  %2625 = vmatpush3.bf16.msra.mxu1 %v2536_v19  ;;  %v2580_v19 = vpack.c.bf16 %v1133_v17, %v1132_v16 }
  0x9e   : > { %2541 = vmatprep.subr.bf16.mxu0 %v2540_v22  ;;  %2618 = vmatprep.subr.bf16.mxu1 %v2540_v22 }
  0xa1   : > { %2543 = vmatpush3.bf16.msra.mxu0 %v2540_v22  ;;  %2626 = vmatpush3.bf16.msra.mxu1 %v2540_v22  ;;  %v1136_v22 = vld [vmem:[#allocation8 + $0x20] sm:$0xff] }
  0xa2   : > { %2545 = vmatprep.subr.bf16.mxu0 %v2544_v25  ;;  %2619 = vmatprep.subr.bf16.mxu1 %v2544_v25  ;;  %v2588_v24 = vpack.c.bf16 %v1137_v23, %v1136_v22 }
  0xa5   : > { %2547 = vmatpush3.bf16.msra.mxu0 %v2544_v25  ;;  %2627 = vmatpush3.bf16.msra.mxu1 %v2544_v25  ;;  %v338_v25 = vlaneseq }
  0xa6   : > { %2549 = vmatprep.subr.bf16.mxu1 %v2548_v28  ;;  %2581 = vmatprep.subr.bf16.mxu0 %v2580_v19 }
  0xa7   : > { %v3452_v26 = vshrl.u32 %v338_v25, 7 }
  0xa8   : > { %2309 = vmatmul.mubr.f32.vlgmr.msra.gmra.mrb[0].mxu0 %v290_v31  ;;  %2333 = vmatmul.mubr.f32.vlgmr.msra.gmra.mrb[0].mxu1 %v306_v32 }
  0xa9   : > { %2311 = vmatprep.mubr.f32.mxu0 %v291_v33  ;;  %2335 = vmatprep.mubr.f32.mxu1 %v307_v34  ;;  %v340_v27 = vsub.s32 0, %v3452_v26 }
  0xaa   : > { %2551 = vmatpush3.bf16.msra.mxu1 %v2548_v28  ;;  %2583 = vmatpush3.bf16.msra.mxu0 %v2580_v19  ;;  %v3458_v28 = vld [vmem:[%s4324_s4] sm:$0x1f] }
  0xab   : > { %2553 = vmatprep.subr.bf16.mxu1 %v2552_v35  ;;  %2585 = vmatprep.subr.bf16.mxu0 %v2584_v21  ;;  %v3461_v29 = vrot.slane %v3458_v28, %v340_v27 }
  0xac   : > { %2312 = vmatmul.mubr.f32.gmra.mrb[2].mxu0 %v292_v38  ;;  %2336 = vmatmul.mubr.f32.gmra.mrb[2].mxu1 %v308_v39 }
  0xad   : > { %2314 = vmatprep.mubr.f32.mxu0 %v293_v40  ;;  %2338 = vmatprep.mubr.f32.mxu1 %v309_v41 }
  0xae   : > { %2555 = vmatpush3.bf16.msra.mxu1 %v2552_v35  ;;  %2587 = vmatpush3.bf16.msra.mxu0 %v2584_v21 }
  0xaf   : > { %2557 = vmatprep.subr.bf16.mxu1 %v2556_v42  ;;  %2589 = vmatprep.subr.bf16.mxu0 %v2588_v24 }
  0xb0   : > { %2315 = vmatmul.mubr.f32.gmra.mrb[4].mxu0 %v294_v43  ;;  %2339 = vmatmul.mubr.f32.gmra.mrb[4].mxu1 %v310_v44 }
  0xb1   : > { %2317 = vmatprep.mubr.f32.mxu0 %v295_v45  ;;  %2341 = vmatprep.mubr.f32.mxu1 %v311_v46 }
  0xb2   : > { %2559 = vmatpush3.bf16.msra.mxu1 %v2556_v42  ;;  %2591 = vmatpush3.bf16.msra.mxu0 %v2588_v24 }
  0xb3   : > { %2561 = vmatprep.subr.bf16.mxu1 %v2560_v3 }
  0xb4   : > { %2318 = vmatmul.mubr.f32.gmra.mrb[6].mxu0 %v296_v47  ;;  %2342 = vmatmul.mubr.f32.gmra.mrb[6].mxu1 %v312_v48 }
  0xb5   : > { %2320 = vmatprep.mubr.f32.mxu0 %v297_v49  ;;  %2344 = vmatprep.mubr.f32.mxu1 %v313_v50 }
  0xb6   : > { %2563 = vmatpush3.bf16.msra.mxu1 %v2560_v3 }
  0xb7   : > { %2565 = vmatprep.subr.bf16.mxu1 %v2564_v6 }
  0xb8   : > { %2321 = vmatmul.mubr.f32.gmra.mrb[8].mxu0 %v298_v51  ;;  %2345 = vmatmul.mubr.f32.gmra.mrb[8].mxu1 %v314_v52 }
  0xb9   : > { %2323 = vmatprep.mubr.f32.mxu0 %v299_v53  ;;  %2347 = vmatprep.mubr.f32.mxu1 %v315_v54 }
  0xba   : > { %2567 = vmatpush3.bf16.msra.mxu1 %v2564_v6 }
  0xbb   : > { %2569 = vmatprep.subr.bf16.mxu1 %v2568_v9 }
  0xbc   : > { %2324 = vmatmul.mubr.f32.gmra.mrb[10].mxu0 %v300_v55  ;;  %2348 = vmatmul.mubr.f32.gmra.mrb[10].mxu1 %v316_v56 }
  0xbd   : > { %2326 = vmatprep.mubr.f32.mxu0 %v301_v57  ;;  %2350 = vmatprep.mubr.f32.mxu1 %v317_v58 }
  0xbe   : > { %2571 = vmatpush3.bf16.msra.mxu1 %v2568_v9 }
  0xbf   : > { %2573 = vmatprep.subr.bf16.mxu1 %v2572_v12 }
  0xc0   : > { %2327 = vmatmul.mubr.f32.gmra.mrb[12].mxu0 %v302_v59  ;;  %2351 = vmatmul.mubr.f32.gmra.mrb[12].mxu1 %v318_v60 }
  0xc1   : > { %2329 = vmatprep.mubr.f32.mxu0 %v303_v61  ;;  %2353 = vmatprep.mubr.f32.mxu1 %v319_v62 }
  0xc2   : > { %2575 = vmatpush3.bf16.msra.mxu1 %v2572_v12 }
  0xc3   : > { %2577 = vmatprep.subr.bf16.mxu1 %v2576_v15 }
  0xc4   : > { %2330 = vmatmul.mubr.f32.gmra.mrb[14].mxu0 %v304_v63  ;;  %2354 = vmatmul.mubr.f32.gmra.mrb[14].mxu1 %v320_v0 }
  0xc6   : > { %2579 = vmatpush3.bf16.msra.mxu1 %v2576_v15 }
 0x17b   : > { %v2310_v30 = vpop.f32.mrb[0].mxu0  ;;  %v2334_v31 = vpop.f32.mrb[0].mxu1 }
 0x17c   : > { %v414_v32 = vadd.f32 %v2310_v30, %v3461_v29  ;;  %v408_v33 = vpop.f32.mrb[1].mxu0  ;;  %v3464_v34 = vpop.f32.mrb[1].mxu1  ;;  %v3506_v12 = vadd.f32 %v2334_v31, %v3461_v29 }
 0x17d   : > { %v409_v35 = vadd.f32 %v408_v33, %v3461_v29  ;;  %v3523_v33 = vadd.f32 %v3464_v34, %v3461_v29 }
 0x17e   : > { %v600_v36 = vmul.f32 0.70710677, %v414_v32  ;;  %v568_v8 = vmul.f32 0.5, %v414_v32  ;;  %v616_v32 = vmul.f32 0.70710677, %v3506_v12 }
 0x17f   : > { %v599_v37 = vmul.f32 0.70710677, %v409_v35  ;;  %v2313_v38 = vpop.f32.mrb[2].mxu0  ;;  %v3467_v39 = vpop.f32.mrb[2].mxu1  ;;  %v567_v3 = vmul.f32 0.5, %v409_v35 }
 0x180   : > { %2709 = verf.f32 %v600_v36  ;;  %v424_v40 = vadd.f32 %v2313_v38, %v3461_v29  ;;  %v418_v41 = vpop.f32.mrb[3].mxu0  ;;  %v3470_v42 = vpop.f32.mrb[3].mxu1 }
 0x181   : > { %2711 = verf.f32 %v599_v37  ;;  %v419_v43 = vadd.f32 %v418_v41, %v3461_v29 }
 0x182   : > { %v602_v44 = vmul.f32 0.70710677, %v424_v40  ;;  %v570_v24 = vmul.f32 0.5, %v424_v40 }
 0x183   : > { %v601_v45 = vmul.f32 0.70710677, %v419_v43  ;;  %v2316_v46 = vpop.f32.mrb[4].mxu0  ;;  %v3476_v49 = vpop.f32.mrb[4].mxu1  ;;  %v569_v19 = vmul.f32 0.5, %v419_v43 }
 0x184   : > { %2713 = verf.f32 %v602_v44  ;;  %v3474_v47 = vadd.f32 %v2316_v46, %v3461_v29  ;;  %v428_v48 = vpop.f32.mrb[5].mxu0  ;;  %v3479_v51 = vpop.f32.mrb[5].mxu1 }
 0x185   : > { %2715 = verf.f32 %v601_v45  ;;  %v429_v50 = vadd.f32 %v428_v48, %v3461_v29 }
 0x186   : > { %v604_v52 = vmul.f32 0.70710677, %v3474_v47  ;;  %v572_v34 = vmul.f32 0.5, %v3474_v47 }
 0x187   : > { %v603_v53 = vmul.f32 0.70710677, %v429_v50  ;;  %v2319_v54 = vpop.f32.mrb[6].mxu0  ;;  %v3482_v55 = vpop.f32.mrb[6].mxu1  ;;  %v571_v44 = vmul.f32 0.5, %v429_v50 }
 0x188   : > { %2717 = verf.f32 %v604_v52  ;;  %v3485_v56 = vadd.f32 %v2319_v54, %v3461_v29  ;;  %v438_v57 = vpop.f32.mrb[7].mxu0  ;;  %v3487_v58 = vpop.f32.mrb[7].mxu1 }
 0x189   : > { %2719 = verf.f32 %v603_v53  ;;  %v3490_v59 = vadd.f32 %v438_v57, %v3461_v29  ;;  %v615_v57 = vmul.f32 0.70710677, %v3523_v33 }
 0x18a   : > { %v2710_v60 = vpop.eup %2709  ;;  %v606_v61 = vmul.f32 0.70710677, %v3485_v56 }
 0x18b   : > { %v2712_v62 = vpop.eup %2711  ;;  %v664_v63 = vadd.f32 1.0, %v2710_v60  ;;  %v605_v0 = vmul.f32 0.70710677, %v3490_v59  ;;  %v2322_v1 = vpop.f32.mrb[8].mxu0  ;;  %v3541_v60 = vadd.f32 %v3470_v42, %v3461_v29 }
 0x18c   : > { %v3494_v2 = vpop.f32.mrb[8].mxu1  ;;  %v663_v4 = vadd.f32 1.0, %v2712_v62  ;;  %2721 = verf.f32 %v606_v61  ;;  %v3497_v5 = vadd.f32 %v2322_v1, %v3461_v29  ;;  %v448_v6 = vpop.f32.mrb[9].mxu0 }
 0x18d   : > { %v3499_v7 = vpop.f32.mrb[9].mxu1  ;;  %2723 = verf.f32 %v605_v0  ;;  %v3502_v9 = vadd.f32 %v448_v6, %v3461_v29  ;;  %v696_v15 = vmul.f32 %v664_v63, %v568_v8 }
 0x18e   : > { %v2714_v10 = vpop.eup %2713  ;;  %v608_v11 = vmul.f32 0.70710677, %v3497_v5  ;;  %v695_v13 = vmul.f32 %v663_v4, %v567_v3  ;;  %v573_v4 = vmul.f32 0.5, %v3490_v59 }
 0x18f   : > { %v2716_v14 = vpop.eup %2715  ;;  %v666_v16 = vadd.f32 1.0, %v2714_v10  ;;  %v607_v17 = vmul.f32 0.70710677, %v3502_v9  ;;  %v2325_v18 = vpop.f32.mrb[10].mxu0 }
 0x190   : > { %v665_v20 = vadd.f32 1.0, %v2716_v14  ;;  %2725 = verf.f32 %v608_v11  ;;  %v3510_v21 = vadd.f32 %v2325_v18, %v3461_v29  ;;  %v458_v22 = vpop.f32.mrb[11].mxu0  ;;  %2388 = vmatprep.mubr.f32.mxu1 %v695_v13  ;;  %v3512_v23 = vpop.f32.mrb[10].mxu1  ;;  %v574_v11 = vmul.f32 0.5, %v3485_v56 }
 0x191   : > { %2727 = verf.f32 %v607_v17  ;;  %v3515_v25 = vadd.f32 %v458_v22, %v3461_v29  ;;  %2389 = vmatmul.mubr.f32.vlgmr.msra.gmra.mrb[16].mxu1 %v696_v15  ;;  %v3517_v27 = vpop.f32.mrb[11].mxu1  ;;  %v698_v41 = vmul.f32 %v666_v16, %v570_v24  ;;  %v3555_v13 = vadd.f32 %v3467_v39, %v3461_v29 }
 0x192   : > { %v2718_v30 = vpop.eup %2717  ;;  %v610_v31 = vmul.f32 0.70710677, %v3510_v21  ;;  %v697_v35 = vmul.f32 %v665_v20, %v569_v19  ;;  %v617_v15 = vmul.f32 0.70710677, %v3541_v60  ;;  %v3565_v20 = vadd.f32 %v3479_v51, %v3461_v29 }
 0x193   : > { %v2720_v36 = vpop.eup %2719  ;;  %v668_v37 = vadd.f32 1.0, %v2718_v30  ;;  %v609_v38 = vmul.f32 0.70710677, %v3515_v25  ;;  %v2328_v40 = vpop.f32.mrb[12].mxu0  ;;  %v575_v22 = vmul.f32 0.5, %v3502_v9  ;;  %v576_v30 = vmul.f32 0.5, %v3497_v5 }
 0x194   : > { %v3526_v43 = vpop.f32.mrb[12].mxu1  ;;  %v667_v45 = vadd.f32 1.0, %v2720_v36  ;;  %2729 = verf.f32 %v610_v31  ;;  %v3529_v46 = vadd.f32 %v2328_v40, %v3461_v29  ;;  %v468_v48 = vpop.f32.mrb[13].mxu0  ;;  %2391 = vmatprep.mubr.f32.mxu1 %v697_v35  ;;  %v618_v31 = vmul.f32 0.70710677, %v3555_v13 }
 0x195   : > { %v3531_v52 = vpop.f32.mrb[13].mxu1  ;;  %2731 = verf.f32 %v609_v38  ;;  %v3535_v53 = vadd.f32 %v468_v48, %v3461_v29  ;;  %2392 = vmatmul.mubr.f32.gmra.mrb[18].mxu1 %v698_v41  ;;  %v700_v1 = vmul.f32 %v668_v37, %v572_v34  ;;  %v3576_v51 = vadd.f32 %v3487_v58, %v3461_v29 }
 0x196   : > { %v2722_v54 = vpop.eup %2721  ;;  %v612_v50 = vmul.f32 0.70710677, %v3529_v46  ;;  %v699_v61 = vmul.f32 %v667_v45, %v571_v44  ;;  %2733 = verf.f32 %v616_v32  ;;  %v3572_v32 = vadd.f32 %v3476_v49, %v3461_v29 }
 0x197   : > { %v2724_v62 = vpop.eup %2723  ;;  %v670_v63 = vadd.f32 1.0, %v2722_v54  ;;  %v611_v47 = vmul.f32 0.70710677, %v3535_v53  ;;  %v2331_v0 = vpop.f32.mrb[14].mxu0  ;;  %v619_v38 = vmul.f32 0.70710677, %v3565_v20  ;;  %v3584_v48 = vadd.f32 %v3482_v55, %v3461_v29 }
 0x198   : > { %v3544_v3 = vpop.f32.mrb[14].mxu1  ;;  %v669_v6 = vadd.f32 1.0, %v2724_v62  ;;  %2735 = verf.f32 %v612_v50  ;;  %v3548_v8 = vadd.f32 %v2331_v0, %v3461_v29  ;;  %v478_v10 = vpop.f32.mrb[15].mxu0  ;;  %2394 = vmatprep.mubr.f32.mxu1 %v699_v61  ;;  %v577_v40 = vmul.f32 0.5, %v3515_v25 }
 0x199   : > { %v3550_v42 = vpop.f32.mrb[15].mxu1  ;;  %2737 = verf.f32 %v611_v47  ;;  %v3558_v14 = vadd.f32 %v478_v10, %v3461_v29  ;;  %2395 = vmatmul.mubr.f32.gmra.mrb[20].mxu1 %v700_v1  ;;  %v702_v39 = vmul.f32 %v670_v63, %v574_v11  ;;  %v578_v49 = vmul.f32 0.5, %v3510_v21 }
 0x19a   : > { %v2726_v59 = vpop.eup %2725  ;;  %2739 = verf.f32 %v615_v57  ;;  %v614_v16 = vmul.f32 0.70710677, %v3548_v8  ;;  %v701_v17 = vmul.f32 %v669_v6, %v573_v4  ;;  %v620_v45 = vmul.f32 0.70710677, %v3572_v32 }
 0x19b   : > { %v2728_v18 = vpop.eup %2727  ;;  %v672_v19 = vadd.f32 1.0, %v2726_v59  ;;  %v613_v56 = vmul.f32 0.70710677, %v3558_v14  ;;  %v621_v34 = vmul.f32 0.70710677, %v3576_v51  ;;  %v3589_v25 = vadd.f32 %v3499_v7, %v3461_v29 }
 0x19c   : > { %v671_v24 = vadd.f32 1.0, %v2728_v18  ;;  %2741 = verf.f32 %v614_v16  ;;  %2397 = vmatprep.mubr.f32.mxu1 %v701_v17  ;;  %v579_v62 = vmul.f32 0.5, %v3535_v53  ;;  %v580_v47 = vmul.f32 0.5, %v3529_v46 }
 0x19d   : > { %2743 = verf.f32 %v613_v56  ;;  %2398 = vmatmul.mubr.f32.gmra.mrb[22].mxu1 %v702_v39  ;;  %v704_v5 = vmul.f32 %v672_v19, %v576_v30  ;;  %v622_v0 = vmul.f32 0.70710677, %v3584_v48  ;;  %v3596_v1 = vadd.f32 %v3494_v2, %v3461_v29 }
 0x19e   : > { %v2730_v35 = vpop.eup %2729  ;;  %v703_v36 = vmul.f32 %v671_v24, %v575_v22  ;;  %2745 = verf.f32 %v617_v15  ;;  %v623_v10 = vmul.f32 0.70710677, %v3589_v25  ;;  %v3601_v53 = vadd.f32 %v3517_v27, %v3461_v29 }
 0x19f   : > { %v2732_v9 = vpop.eup %2731  ;;  %v674_v37 = vadd.f32 1.0, %v2730_v35  ;;  %2747 = verf.f32 %v618_v31  ;;  %v583_v11 = vmul.f32 0.5, %v3523_v33  ;;  %v581_v15 = vmul.f32 0.5, %v3558_v14 }
 0x1a0   : > { %v673_v41 = vadd.f32 1.0, %v2732_v9  ;;  %2400 = vmatprep.mubr.f32.mxu1 %v703_v36  ;;  %v2734_v44 = vpop.eup %2733  ;;  %2749 = verf.f32 %v619_v38  ;;  %v584_v2 = vmul.f32 0.5, %v3506_v12  ;;  %v582_v19 = vmul.f32 0.5, %v3548_v8 }
 0x1a1   : > { %2401 = vmatmul.mubr.f32.gmra.mrb[24].mxu1 %v704_v5  ;;  %v706_v21 = vmul.f32 %v674_v37, %v578_v49  ;;  %2751 = verf.f32 %v620_v45  ;;  %v680_v18 = vadd.f32 1.0, %v2734_v44  ;;  %v624_v56 = vmul.f32 0.70710677, %v3596_v1 }
 0x1a2   : > { %v2736_v58 = vpop.eup %2735  ;;  %v705_v54 = vmul.f32 %v673_v41, %v577_v40  ;;  %2753 = verf.f32 %v621_v34  ;;  %v3610_v27 = vadd.f32 %v3512_v23, %v3461_v29  ;;  %v625_v14 = vmul.f32 0.70710677, %v3601_v53 }
 0x1a3   : > { %v2738_v57 = vpop.eup %2737  ;;  %v676_v50 = vadd.f32 1.0, %v2736_v58  ;;  %2755 = verf.f32 %v622_v0  ;;  %v3615_v22 = vadd.f32 %v3531_v52, %v3461_v29  ;;  %v585_v8 = vmul.f32 0.5, %v3541_v60 }
 0x1a4   : > { %v2740_v61 = vpop.eup %2739  ;;  %v675_v63 = vadd.f32 1.0, %v2738_v57  ;;  %2403 = vmatprep.mubr.f32.mxu1 %v705_v54  ;;  %2757 = verf.f32 %v623_v10  ;;  %v586_v35 = vmul.f32 0.5, %v3555_v13  ;;  %v626_v36 = vmul.f32 0.70710677, %v3610_v27 }
 0x1a5   : > { %2404 = vmatmul.mubr.f32.gmra.mrb[26].mxu1 %v706_v21  ;;  %v708_v46 = vmul.f32 %v676_v50, %v580_v47  ;;  %v679_v59 = vadd.f32 1.0, %v2740_v61  ;;  %2759 = verf.f32 %v624_v56  ;;  %v554_v9 = vadd.f32 %v3526_v43, %v3461_v29 }
 0x1a6   : > { %v2742_v55 = vpop.eup %2741  ;;  %v707_v7 = vmul.f32 %v675_v63, %v579_v62  ;;  %2761 = verf.f32 %v625_v14  ;;  %v627_v37 = vmul.f32 0.70710677, %v3615_v22  ;;  %v559_v60 = vadd.f32 %v3550_v42, %v3461_v29 }
 0x1a7   : > { %v2744_v4 = vpop.eup %2743  ;;  %v678_v6 = vadd.f32 1.0, %v2742_v55  ;;  %v711_v30 = vmul.f32 %v679_v59, %v583_v11  ;;  %v712_v38 = vmul.f32 %v680_v18, %v584_v2  ;;  %v587_v13 = vmul.f32 0.5, %v3565_v20 }
 0x1a8   : > { %v677_v16 = vadd.f32 1.0, %v2744_v4  ;;  %2406 = vmatprep.mubr.f32.mxu1 %v707_v7  ;;  %v2746_v17 = vpop.eup %2745  ;;  %v588_v44 = vmul.f32 0.5, %v3572_v32  ;;  %2763 = verf.f32 %v626_v36  ;;  %v628_v49 = vmul.f32 0.70710677, %v554_v9  ;;  %v1141_v36 = vld [vmem:[#allocation8 + $0x48] sm:$0xff] }
 0x1a9   : > { %2407 = vmatmul.mubr.f32.gmra.mrb[28].mxu1 %v708_v46  ;;  %v2748_v39 = vpop.eup %2747  ;;  %v710_v12 = vmul.f32 %v678_v6, %v582_v19  ;;  %v681_v24 = vadd.f32 1.0, %v2746_v17  ;;  %v564_v43 = vadd.f32 %v3544_v3, %v3461_v29  ;;  %2765 = verf.f32 %v627_v37  ;;  %v1143_v37 = vld [vmem:[#allocation8 + $0x58] sm:$0xff] }
 0x1aa   : > { %v709_v33 = vmul.f32 %v677_v16, %v581_v15  ;;  %v2750_v31 = vpop.eup %2749  ;;  %v682_v23 = vadd.f32 1.0, %v2748_v39  ;;  %v629_v58 = vmul.f32 0.70710677, %v559_v60  ;;  %v589_v54 = vmul.f32 0.5, %v3576_v51 }
 0x1ab   : > { %v2752_v52 = vpop.eup %2751  ;;  %v683_v40 = vadd.f32 1.0, %v2750_v31  ;;  %v713_v41 = vmul.f32 %v681_v24, %v585_v8  ;;  %2767 = verf.f32 %v628_v49  ;;  %v630_v21 = vmul.f32 0.70710677, %v564_v43  ;;  %v1139_v31 = vld [vmem:[#allocation8 + $0x38] sm:$0xff] }
 0x1ac   : > { %2409 = vmatprep.mubr.f32.mxu1 %v709_v33  ;;  %v2754_v5 = vpop.eup %2753  ;;  %v684_v45 = vadd.f32 1.0, %v2752_v52  ;;  %v714_v34 = vmul.f32 %v682_v23, %v586_v35  ;;  %v590_v32 = vmul.f32 0.5, %v3584_v48  ;;  %2769 = verf.f32 %v629_v58  ;;  %v1140_v23 = vld [vmem:[#allocation8 + $0x40] sm:$0xff]  ;;  %v1142_v52 = vld [vmem:[#allocation8 + $0x50] sm:$0xff] }
 0x1ad   : > { %2410 = vmatmul.mubr.f32.gmra.mrb[30].mxu1 %v710_v12  ;;  %v2756_v42 = vpop.eup %2755  ;;  %v685_v57 = vadd.f32 1.0, %v2754_v5  ;;  %v715_v20 = vmul.f32 %v683_v40, %v587_v13  ;;  %v591_v62 = vmul.f32 0.5, %v3589_v25  ;;  %2771 = verf.f32 %v630_v21  ;;  %v1145_v5 = vld [vmem:[#allocation8 + $0x68] sm:$0xff]  ;;  %v1146_v40 = vld [vmem:[#allocation8 + $0x70] sm:$0xff] }
 0x1ae   : > { %2412 = vmatprep.mubr.f32.mxu1 %v711_v30  ;;  %v2758_v50 = vpop.eup %2757  ;;  %v686_v61 = vadd.f32 1.0, %v2756_v42  ;;  %v716_v29 = vmul.f32 %v684_v45, %v588_v44  ;;  %v592_v51 = vmul.f32 0.5, %v3596_v1  ;;  %v593_v6 = vmul.f32 0.5, %v3601_v53  ;;  %v1138_v30 = vld [vmem:[#allocation8 + $0x30] sm:$0xff] }
 0x1af   : > { %v2760_v3 = vpop.eup %2759  ;;  %v687_v63 = vadd.f32 1.0, %v2758_v50  ;;  %v717_v47 = vmul.f32 %v685_v57, %v589_v54  ;;  %v594_v25 = vmul.f32 0.5, %v3610_v27  ;;  %v595_v16 = vmul.f32 0.5, %v3615_v22 }
 0x1b0   : > { %v2762_v55 = vpop.eup %2761  ;;  %v688_v0 = vadd.f32 1.0, %v2760_v3  ;;  %v718_v7 = vmul.f32 %v686_v61, %v590_v32  ;;  %v596_v18 = vmul.f32 0.5, %v554_v9  ;;  %v597_v33 = vmul.f32 0.5, %v559_v60 }
 0x1b1   : > { %2413 = vmatmul.mubr.f32.gmra.mrb[32].mxu1 %v712_v38  ;;  %v689_v48 = vadd.f32 1.0, %v2762_v55  ;;  %v719_v10 = vmul.f32 %v687_v63, %v591_v62  ;;  %v598_v27 = vmul.f32 0.5, %v564_v43  ;;  %v2592_v35 = vpack.c.bf16 %v1139_v31, %v1138_v30  ;;  %v1144_v38 = vld [vmem:[#allocation8 + $0x60] sm:$0xff] }
 0x1b2   : > { %2415 = vmatprep.mubr.f32.mxu1 %v713_v41  ;;  %v2764_v4 = vpop.eup %2763  ;;  %v720_v59 = vmul.f32 %v688_v0, %v592_v51  ;;  %v2596_v9 = vpack.c.bf16 %v1141_v36, %v1140_v23  ;;  %v2600_v60 = vpack.c.bf16 %v1143_v37, %v1142_v52  ;;  %v2604_v13 = vpack.c.bf16 %v1145_v5, %v1144_v38  ;;  %v1147_v41 = vld [vmem:[#allocation8 + $0x78] sm:$0xff] }
 0x1b3   : > { %v2766_v46 = vpop.eup %2765  ;;  %v690_v11 = vadd.f32 1.0, %v2764_v4  ;;  %v721_v2 = vmul.f32 %v689_v48, %v593_v6  ;;  %2593 = vmatprep.subr.bf16.mxu0 %v2592_v35  ;;  %v2608_v44 = vpack.c.bf16 %v1147_v41, %v1146_v40  ;;  %v745_v49 = vsub.s32 1, %v3452_v26 }
 0x1b4   : > { %v691_v17 = vadd.f32 1.0, %v2766_v46  ;;  %2595 = vmatpush3.bf16.msra.mxu0 %v2592_v35 }
 0x1b5   : > { %2416 = vmatmul.mubr.f32.gmra.mrb[34].mxu1 %v714_v34  ;;  %v2768_v15 = vpop.eup %2767  ;;  %v722_v53 = vmul.f32 %v690_v11, %v594_v25  ;;  %2597 = vmatprep.subr.bf16.mxu0 %v2596_v9  ;;  %v3638_v43 = vrot.slane %v3458_v28, %v745_v49 }
 0x1b6   : > { %2418 = vmatprep.mubr.f32.mxu1 %v715_v20  ;;  %v2770_v1 = vpop.eup %2769  ;;  %v692_v19 = vadd.f32 1.0, %v2768_v15  ;;  %v723_v14 = vmul.f32 %v691_v17, %v595_v16 }
 0x1b7   : > { %v2772_v56 = vpop.eup %2771  ;;  %v693_v39 = vadd.f32 1.0, %v2770_v1 }
 0x1b8   : > { %v694_v12 = vadd.f32 1.0, %v2772_v56  ;;  %v724_v8 = vmul.f32 %v692_v19, %v596_v18  ;;  %2599 = vmatpush3.bf16.msra.mxu0 %v2596_v9 }
 0x1b9   : > { %2419 = vmatmul.mubr.f32.gmra.mrb[36].mxu1 %v716_v29  ;;  %v725_v24 = vmul.f32 %v693_v39, %v597_v33  ;;  %2601 = vmatprep.subr.bf16.mxu0 %v2600_v60 }
 0x1ba   : > { %2421 = vmatprep.mubr.f32.mxu1 %v717_v47  ;;  %v726_v22 = vmul.f32 %v694_v12, %v598_v27 }
 0x1bc   : > { %2603 = vmatpush3.bf16.msra.mxu0 %v2600_v60 }
 0x1bd   : > { %2422 = vmatmul.mubr.f32.gmra.mrb[38].mxu1 %v718_v7  ;;  %2605 = vmatprep.subr.bf16.mxu0 %v2604_v13 }
 0x1be   : > { %2424 = vmatprep.mubr.f32.mxu1 %v719_v10 }
 0x1c0   : > { %2607 = vmatpush3.bf16.msra.mxu0 %v2604_v13 }
 0x1c1   : > { %2425 = vmatmul.mubr.f32.gmra.mrb[40].mxu1 %v720_v59  ;;  %2609 = vmatprep.subr.bf16.mxu0 %v2608_v44 }
 0x1c2   : > { %2427 = vmatprep.mubr.f32.mxu1 %v721_v2 }
 0x1c4   : > { %2611 = vmatpush3.bf16.msra.mxu0 %v2608_v44 }
 0x1c5   : > { %2428 = vmatmul.mubr.f32.gmra.mrb[42].mxu1 %v722_v53 }
 0x1c6   : > { %2430 = vmatprep.mubr.f32.mxu1 %v723_v14 }
 0x1c9   : > { %2431 = vmatmul.mubr.f32.gmra.mrb[44].mxu1 %v724_v8 }
 0x1ca   : > { %2433 = vmatprep.mubr.f32.mxu1 %v725_v24 }
 0x1cd   : > { %2434 = vmatmul.mubr.f32.gmra.mrb[46].mxu1 %v726_v22 }
 0x264   : > { %v2390_v45 = vpop.f32.mrb[16].mxu1 }
 0x265   : > { %v819_v58 = vadd.f32 %v2390_v45, %v3638_v43  ;;  %v813_v34 = vpop.f32.mrb[17].mxu1 }
 0x266   : > { %v814_v42 = vadd.f32 %v813_v34, %v3638_v43 }
 0x267   : > { %v1005_v54 = vmul.f32 0.70710677, %v819_v58  ;;  %v973_v2 = vmul.f32 0.5, %v819_v58 }
 0x268   : > { %v1004_v57 = vmul.f32 0.70710677, %v814_v42  ;;  %v2393_v20 = vpop.f32.mrb[18].mxu1  ;;  %v972_v59 = vmul.f32 0.5, %v814_v42 }
 0x269   : > { %2773 = verf.f32 %v1005_v54  ;;  %v829_v50 = vadd.f32 %v2393_v20, %v3638_v43  ;;  %v823_v21 = vpop.f32.mrb[19].mxu1 }
 0x26a   : > { %2775 = verf.f32 %v1004_v57  ;;  %v824_v32 = vadd.f32 %v823_v21, %v3638_v43 }
 0x26b   : > { %v1007_v61 = vmul.f32 0.70710677, %v829_v50  ;;  %v975_v30 = vmul.f32 0.5, %v829_v50 }
 0x26c   : > { %v1006_v29 = vmul.f32 0.70710677, %v824_v32  ;;  %v2396_v28 = vpop.f32.mrb[20].mxu1  ;;  %v974_v12 = vmul.f32 0.5, %v824_v32 }
 0x26d   : > { %2777 = verf.f32 %v1007_v61  ;;  %v839_v3 = vadd.f32 %v2396_v28, %v3638_v43  ;;  %v833_v62 = vpop.f32.mrb[21].mxu1 }
 0x26e   : > { %2779 = verf.f32 %v1006_v29  ;;  %v834_v63 = vadd.f32 %v833_v62, %v3638_v43 }
 0x26f   : > { %v1009_v47 = vmul.f32 0.70710677, %v839_v3  ;;  %v977_v44 = vmul.f32 0.5, %v839_v3 }
 0x270   : > { %v1008_v55 = vmul.f32 0.70710677, %v834_v63  ;;  %v2399_v51 = vpop.f32.mrb[22].mxu1  ;;  %v976_v5 = vmul.f32 0.5, %v834_v63 }
 0x271   : > { %2781 = verf.f32 %v1009_v47  ;;  %v3647_v0 = vadd.f32 %v2399_v51, %v3638_v43  ;;  %v843_v7 = vpop.f32.mrb[23].mxu1 }
 0x272   : > { %2783 = verf.f32 %v1008_v55  ;;  %v844_v4 = vadd.f32 %v843_v7, %v3638_v43 }
 0x273   : > { %v2774_v6 = vpop.eup %2773  ;;  %v1011_v48 = vmul.f32 0.70710677, %v3647_v0  ;;  %v979_v28 = vmul.f32 0.5, %v3647_v0 }
 0x274   : > { %v2776_v10 = vpop.eup %2775  ;;  %v1069_v46 = vadd.f32 1.0, %v2774_v6  ;;  %v1010_v25 = vmul.f32 0.70710677, %v844_v4  ;;  %v2402_v11 = vpop.f32.mrb[24].mxu1  ;;  %v978_v21 = vmul.f32 0.5, %v844_v4 }
 0x275   : > { %v1068_v15 = vadd.f32 1.0, %v2776_v10  ;;  %2785 = verf.f32 %v1011_v48  ;;  %v3652_v16 = vadd.f32 %v2402_v11, %v3638_v43  ;;  %v853_v17 = vpop.f32.mrb[25].mxu1 }
 0x276   : > { %2787 = verf.f32 %v1010_v25  ;;  %v3655_v1 = vadd.f32 %v853_v17, %v3638_v43  ;;  %v1101_v33 = vmul.f32 %v1069_v46, %v973_v2 }
 0x277   : > { %v2778_v18 = vpop.eup %2777  ;;  %v1013_v19 = vmul.f32 0.70710677, %v3652_v16  ;;  %v1100_v53 = vmul.f32 %v1068_v15, %v972_v59  ;;  %v981_v25 = vmul.f32 0.5, %v3652_v16 }
 0x278   : > { %v2780_v56 = vpop.eup %2779  ;;  %v1071_v39 = vadd.f32 1.0, %v2778_v18  ;;  %v1012_v14 = vmul.f32 0.70710677, %v3655_v1  ;;  %v2405_v27 = vpop.f32.mrb[26].mxu1  ;;  %v980_v48 = vmul.f32 0.5, %v3655_v1 }
 0x279   : > { %v1070_v8 = vadd.f32 1.0, %v2780_v56  ;;  %2789 = verf.f32 %v1013_v19  ;;  %v3660_v24 = vadd.f32 %v2405_v27, %v3638_v43  ;;  %v863_v22 = vpop.f32.mrb[27].mxu1  ;;  %2468 = vmatprep.mubr.f32.mxu0 %v1100_v53 }
 0x27a   : > { %2791 = verf.f32 %v1012_v14  ;;  %v3663_v31 = vadd.f32 %v863_v22, %v3638_v43  ;;  %2469 = vmatmul.mubr.f32.vlgmr.msra.gmra.mrb[16].mxu0 %v1101_v33  ;;  %v1103_v38 = vmul.f32 %v1071_v39, %v975_v30 }
 0x27b   : > { %v2782_v35 = vpop.eup %2781  ;;  %v1015_v23 = vmul.f32 0.70710677, %v3660_v24  ;;  %v1102_v36 = vmul.f32 %v1070_v8, %v974_v12  ;;  %v983_v14 = vmul.f32 0.5, %v3660_v24 }
 0x27c   : > { %v2784_v9 = vpop.eup %2783  ;;  %v1073_v52 = vadd.f32 1.0, %v2782_v35  ;;  %v1014_v37 = vmul.f32 0.70710677, %v3663_v31  ;;  %v2408_v60 = vpop.f32.mrb[28].mxu1  ;;  %v982_v56 = vmul.f32 0.5, %v3663_v31 }
 0x27d   : > { %v1072_v13 = vadd.f32 1.0, %v2784_v9  ;;  %2793 = verf.f32 %v1015_v23  ;;  %v3668_v40 = vadd.f32 %v2408_v60, %v3638_v43  ;;  %v873_v41 = vpop.f32.mrb[29].mxu1  ;;  %2471 = vmatprep.mubr.f32.mxu0 %v1102_v36 }
 0x27e   : > { %2795 = verf.f32 %v1014_v37  ;;  %v3671_v49 = vadd.f32 %v873_v41, %v3638_v43  ;;  %2472 = vmatmul.mubr.f32.gmra.mrb[18].mxu0 %v1103_v38  ;;  %v1105_v50 = vmul.f32 %v1073_v52, %v977_v44 }
 0x27f   : > { %v2786_v45 = vpop.eup %2785  ;;  %v1017_v58 = vmul.f32 0.70710677, %v3668_v40  ;;  %v1104_v34 = vmul.f32 %v1072_v13, %v976_v5  ;;  %v985_v60 = vmul.f32 0.5, %v3668_v40 }
 0x280   : > { %v2788_v42 = vpop.eup %2787  ;;  %v1075_v54 = vadd.f32 1.0, %v2786_v45  ;;  %v1016_v57 = vmul.f32 0.70710677, %v3671_v49  ;;  %v2411_v20 = vpop.f32.mrb[30].mxu1  ;;  %v984_v9 = vmul.f32 0.5, %v3671_v49 }
 0x281   : > { %v1074_v32 = vadd.f32 1.0, %v2788_v42  ;;  %2797 = verf.f32 %v1017_v58  ;;  %v3676_v61 = vadd.f32 %v2411_v20, %v3638_v43  ;;  %v883_v29 = vpop.f32.mrb[31].mxu1  ;;  %2474 = vmatprep.mubr.f32.mxu0 %v1104_v34 }
 0x282   : > { %2799 = verf.f32 %v1016_v57  ;;  %v3680_v3 = vadd.f32 %v883_v29, %v3638_v43  ;;  %2475 = vmatmul.mubr.f32.gmra.mrb[20].mxu0 %v1105_v50  ;;  %v1107_v6 = vmul.f32 %v1075_v54, %v979_v28 }
 0x283   : > { %v2790_v62 = vpop.eup %2789  ;;  %v1019_v63 = vmul.f32 0.70710677, %v3676_v61  ;;  %v1106_v47 = vmul.f32 %v1074_v32, %v978_v21  ;;  %v987_v20 = vmul.f32 0.5, %v3676_v61 }
 0x284   : > { %v2792_v55 = vpop.eup %2791  ;;  %v1077_v51 = vadd.f32 1.0, %v2790_v62  ;;  %v1018_v7 = vmul.f32 0.70710677, %v3680_v3  ;;  %v2414_v4 = vpop.f32.mrb[32].mxu1  ;;  %v986_v42 = vmul.f32 0.5, %v3680_v3 }
 0x285   : > { %v1076_v10 = vadd.f32 1.0, %v2792_v55  ;;  %2801 = verf.f32 %v1019_v63  ;;  %v3686_v0 = vadd.f32 %v2414_v4, %v3638_v43  ;;  %v893_v46 = vpop.f32.mrb[33].mxu1  ;;  %2477 = vmatprep.mubr.f32.mxu0 %v1106_v47 }
 0x286   : > { %2803 = verf.f32 %v1018_v7  ;;  %v3690_v11 = vadd.f32 %v893_v46, %v3638_v43  ;;  %2478 = vmatmul.mubr.f32.gmra.mrb[22].mxu0 %v1107_v6  ;;  %v1109_v53 = vmul.f32 %v1077_v51, %v981_v25 }
 0x287   : > { %v2794_v59 = vpop.eup %2793  ;;  %v1021_v15 = vmul.f32 0.70710677, %v3686_v0  ;;  %v1108_v17 = vmul.f32 %v1076_v10, %v980_v48  ;;  %v989_v4 = vmul.f32 0.5, %v3686_v0 }
 0x288   : > { %v2796_v2 = vpop.eup %2795  ;;  %v1079_v1 = vadd.f32 1.0, %v2794_v59  ;;  %v1020_v18 = vmul.f32 0.70710677, %v3690_v11  ;;  %v2417_v19 = vpop.f32.mrb[34].mxu1  ;;  %v988_v55 = vmul.f32 0.5, %v3690_v11 }
 0x289   : > { %v1078_v33 = vadd.f32 1.0, %v2796_v2  ;;  %2805 = verf.f32 %v1021_v15  ;;  %v3696_v16 = vadd.f32 %v2417_v19, %v3638_v43  ;;  %v903_v39 = vpop.f32.mrb[35].mxu1  ;;  %2480 = vmatprep.mubr.f32.mxu0 %v1108_v17 }
 0x28a   : > { %2807 = verf.f32 %v1020_v18  ;;  %v3700_v27 = vadd.f32 %v903_v39, %v3638_v43  ;;  %2481 = vmatmul.mubr.f32.gmra.mrb[24].mxu0 %v1109_v53  ;;  %v1111_v36 = vmul.f32 %v1079_v1, %v983_v14 }
 0x28b   : > { %v2798_v12 = vpop.eup %2797  ;;  %v1023_v8 = vmul.f32 0.70710677, %v3696_v16  ;;  %v1110_v22 = vmul.f32 %v1078_v33, %v982_v56  ;;  %v991_v19 = vmul.f32 0.5, %v3696_v16 }
 0x28c   : > { %v2800_v30 = vpop.eup %2799  ;;  %v1081_v31 = vadd.f32 1.0, %v2798_v12  ;;  %v1022_v35 = vmul.f32 0.70710677, %v3700_v27  ;;  %v2420_v23 = vpop.f32.mrb[36].mxu1  ;;  %v990_v2 = vmul.f32 0.5, %v3700_v27 }
 0x28d   : > { %v1080_v52 = vadd.f32 1.0, %v2800_v30  ;;  %2809 = verf.f32 %v1023_v8  ;;  %v3706_v24 = vadd.f32 %v2420_v23, %v3638_v43  ;;  %v913_v37 = vpop.f32.mrb[37].mxu1  ;;  %2483 = vmatprep.mubr.f32.mxu0 %v1110_v22 }
 0x28e   : > { %2811 = verf.f32 %v1022_v35  ;;  %v3710_v38 = vadd.f32 %v913_v37, %v3638_v43  ;;  %2484 = vmatmul.mubr.f32.gmra.mrb[26].mxu0 %v1111_v36  ;;  %v1113_v34 = vmul.f32 %v1081_v31, %v985_v60 }
 0x28f   : > { %v2802_v5 = vpop.eup %2801  ;;  %v1025_v13 = vmul.f32 0.70710677, %v3706_v24  ;;  %v1112_v41 = vmul.f32 %v1080_v52, %v984_v9  ;;  %v993_v23 = vmul.f32 0.5, %v3706_v24 }
 0x290   : > { %v2804_v44 = vpop.eup %2803  ;;  %v1083_v49 = vadd.f32 1.0, %v2802_v5  ;;  %v1024_v45 = vmul.f32 0.70710677, %v3710_v38  ;;  %v2423_v58 = vpop.f32.mrb[38].mxu1  ;;  %v992_v30 = vmul.f32 0.5, %v3710_v38 }
 0x291   : > { %v1082_v54 = vadd.f32 1.0, %v2804_v44  ;;  %2813 = verf.f32 %v1025_v13  ;;  %v3716_v40 = vadd.f32 %v2423_v58, %v3638_v43  ;;  %v923_v57 = vpop.f32.mrb[39].mxu1  ;;  %2486 = vmatprep.mubr.f32.mxu0 %v1112_v41 }
 0x292   : > { %2815 = verf.f32 %v1024_v45  ;;  %v3720_v50 = vadd.f32 %v923_v57, %v3638_v43  ;;  %2487 = vmatmul.mubr.f32.gmra.mrb[28].mxu0 %v1113_v34  ;;  %v1115_v47 = vmul.f32 %v1083_v49, %v987_v20 }
 0x293   : > { %v2806_v21 = vpop.eup %2805  ;;  %v1027_v32 = vmul.f32 0.70710677, %v3716_v40  ;;  %v1114_v29 = vmul.f32 %v1082_v54, %v986_v42  ;;  %v995_v24 = vmul.f32 0.5, %v3716_v40 }
 0x294   : > { %v2808_v28 = vpop.eup %2807  ;;  %v1085_v3 = vadd.f32 1.0, %v2806_v21  ;;  %v1026_v62 = vmul.f32 0.70710677, %v3720_v50  ;;  %v2426_v63 = vpop.f32.mrb[40].mxu1  ;;  %v994_v44 = vmul.f32 0.5, %v3720_v50 }
 0x295   : > { %v1084_v51 = vadd.f32 1.0, %v2808_v28  ;;  %2817 = verf.f32 %v1027_v32  ;;  %v3726_v61 = vadd.f32 %v2426_v63, %v3638_v43  ;;  %v933_v7 = vpop.f32.mrb[41].mxu1  ;;  %2489 = vmatprep.mubr.f32.mxu0 %v1114_v29 }
 0x296   : > { %2819 = verf.f32 %v1026_v62  ;;  %v3730_v6 = vadd.f32 %v933_v7, %v3638_v43  ;;  %2490 = vmatmul.mubr.f32.gmra.mrb[30].mxu0 %v1115_v47  ;;  %v1117_v17 = vmul.f32 %v1085_v3, %v989_v4 }
 0x297   : > { %v2810_v48 = vpop.eup %2809  ;;  %v1029_v10 = vmul.f32 0.70710677, %v3726_v61  ;;  %v1116_v46 = vmul.f32 %v1084_v51, %v988_v55  ;;  %v997_v3 = vmul.f32 0.5, %v3726_v61 }
 0x298   : > { %v2812_v25 = vpop.eup %2811  ;;  %v1087_v11 = vadd.f32 1.0, %v2810_v48  ;;  %v1028_v59 = vmul.f32 0.70710677, %v3730_v6  ;;  %v2429_v15 = vpop.f32.mrb[42].mxu1  ;;  %v996_v50 = vmul.f32 0.5, %v3730_v6 }
 0x299   : > { %v1086_v1 = vadd.f32 1.0, %v2812_v25  ;;  %2821 = verf.f32 %v1029_v10  ;;  %v3736_v0 = vadd.f32 %v2429_v15, %v3638_v43  ;;  %v943_v18 = vpop.f32.mrb[43].mxu1  ;;  %2492 = vmatprep.mubr.f32.mxu0 %v1116_v46 }
 0x29a   : > { %2823 = verf.f32 %v1028_v59  ;;  %v944_v53 = vadd.f32 %v943_v18, %v3638_v43  ;;  %2493 = vmatmul.mubr.f32.gmra.mrb[32].mxu0 %v1117_v17  ;;  %v1119_v22 = vmul.f32 %v1087_v11, %v991_v19 }
 0x29b   : > { %v2814_v56 = vpop.eup %2813  ;;  %v1031_v33 = vmul.f32 0.70710677, %v3736_v0  ;;  %v1118_v39 = vmul.f32 %v1086_v1, %v990_v2  ;;  %v999_v7 = vmul.f32 0.5, %v3736_v0 }
 0x29c   : > { %v2816_v14 = vpop.eup %2815  ;;  %v1089_v12 = vadd.f32 1.0, %v2814_v56  ;;  %v1030_v27 = vmul.f32 0.70710677, %v944_v53  ;;  %v2432_v8 = vpop.f32.mrb[44].mxu1  ;;  %v998_v55 = vmul.f32 0.5, %v944_v53 }
 0x29d   : > { %v1088_v31 = vadd.f32 1.0, %v2816_v14  ;;  %2825 = verf.f32 %v1031_v33  ;;  %v959_v35 = vadd.f32 %v2432_v8, %v3638_v43  ;;  %v953_v16 = vpop.f32.mrb[45].mxu1  ;;  %2495 = vmatprep.mubr.f32.mxu0 %v1118_v39  ;;  %v1150_v33 = vsub.s32 2, %v3452_v26  ;;  %v3756_v39 = vld [vmem:[%s4324_s4] sm:$0x1f] }
 0x29e   : > { %2827 = verf.f32 %v1030_v27  ;;  %v954_v36 = vadd.f32 %v953_v16, %v3638_v43  ;;  %2496 = vmatmul.mubr.f32.gmra.mrb[34].mxu0 %v1119_v22  ;;  %v1121_v38 = vmul.f32 %v1089_v12, %v993_v23 }
 0x29f   : > { %v2818_v9 = vpop.eup %2817  ;;  %v1033_v52 = vmul.f32 0.70710677, %v959_v35  ;;  %v1120_v37 = vmul.f32 %v1088_v31, %v992_v30  ;;  %v1001_v11 = vmul.f32 0.5, %v959_v35  ;;  %v3759_v14 = vrot.slane %v3756_v39, %v1150_v33 }
 0x2a0   : > { %v2820_v60 = vpop.eup %2819  ;;  %v1091_v5 = vadd.f32 1.0, %v2818_v9  ;;  %v1032_v13 = vmul.f32 0.70710677, %v954_v36  ;;  %v2435_v41 = vpop.f32.mrb[46].mxu1  ;;  %v1000_v25 = vmul.f32 0.5, %v954_v36 }
 0x2a1   : > { %v1090_v49 = vadd.f32 1.0, %v2820_v60  ;;  %2829 = verf.f32 %v1033_v52  ;;  %v969_v45 = vadd.f32 %v2435_v41, %v3638_v43  ;;  %v963_v58 = vpop.f32.mrb[47].mxu1  ;;  %2498 = vmatprep.mubr.f32.mxu0 %v1120_v37 }
 0x2a2   : > { %2831 = verf.f32 %v1032_v13  ;;  %v964_v34 = vadd.f32 %v963_v58, %v3638_v43  ;;  %2499 = vmatmul.mubr.f32.gmra.mrb[36].mxu0 %v1121_v38  ;;  %v1123_v29 = vmul.f32 %v1091_v5, %v995_v24 }
 0x2a3   : > { %v2822_v42 = vpop.eup %2821  ;;  %v1035_v54 = vmul.f32 0.70710677, %v969_v45  ;;  %v1122_v57 = vmul.f32 %v1090_v49, %v994_v44  ;;  %v1003_v0 = vmul.f32 0.5, %v969_v45 }
 0x2a4   : > { %v2824_v20 = vpop.eup %2823  ;;  %v1093_v21 = vadd.f32 1.0, %v2822_v42  ;;  %v1034_v32 = vmul.f32 0.70710677, %v964_v34  ;;  %v1002_v18 = vmul.f32 0.5, %v964_v34 }
 0x2a5   : > { %v1092_v28 = vadd.f32 1.0, %v2824_v20  ;;  %2833 = verf.f32 %v1035_v54  ;;  %2501 = vmatprep.mubr.f32.mxu0 %v1122_v57 }
 0x2a6   : > { %2835 = verf.f32 %v1034_v32  ;;  %2502 = vmatmul.mubr.f32.gmra.mrb[38].mxu0 %v1123_v29  ;;  %v1125_v47 = vmul.f32 %v1093_v21, %v997_v3 }
 0x2a7   : > { %v2826_v40 = vpop.eup %2825  ;;  %v1124_v62 = vmul.f32 %v1092_v28, %v996_v50 }
 0x2a8   : > { %v2828_v43 = vpop.eup %2827  ;;  %v1095_v63 = vadd.f32 1.0, %v2826_v40 }
 0x2a9   : > { %v1094_v51 = vadd.f32 1.0, %v2828_v43  ;;  %2504 = vmatprep.mubr.f32.mxu0 %v1124_v62 }
 0x2aa   : > { %2505 = vmatmul.mubr.f32.gmra.mrb[40].mxu0 %v1125_v47  ;;  %v1127_v46 = vmul.f32 %v1095_v63, %v999_v7 }
 0x2ab   : > { %v2830_v4 = vpop.eup %2829  ;;  %v1126_v6 = vmul.f32 %v1094_v51, %v998_v55 }
 0x2ac   : > { %v2832_v48 = vpop.eup %2831  ;;  %v1097_v10 = vadd.f32 1.0, %v2830_v4 }
 0x2ad   : > { %v1096_v61 = vadd.f32 1.0, %v2832_v48  ;;  %2507 = vmatprep.mubr.f32.mxu0 %v1126_v6 }
 0x2ae   : > { %2508 = vmatmul.mubr.f32.gmra.mrb[42].mxu0 %v1127_v46  ;;  %v1129_v1 = vmul.f32 %v1097_v10, %v1001_v11 }
 0x2af   : > { %v2834_v59 = vpop.eup %2833  ;;  %v1128_v15 = vmul.f32 %v1096_v61, %v1000_v25 }
 0x2b0   : > { %v2836_v17 = vpop.eup %2835  ;;  %v1099_v2 = vadd.f32 1.0, %v2834_v59 }
 0x2b1   : > { %v1098_v19 = vadd.f32 1.0, %v2836_v17  ;;  %2510 = vmatprep.mubr.f32.mxu0 %v1128_v15 }
 0x2b2   : > { %2511 = vmatmul.mubr.f32.gmra.mrb[44].mxu0 %v1129_v1  ;;  %v1131_v56 = vmul.f32 %v1099_v2, %v1003_v0 }
 0x2b3   : > { %v1130_v53 = vmul.f32 %v1098_v19, %v1002_v18 }
 0x2b5   : > { %2513 = vmatprep.mubr.f32.mxu0 %v1130_v53 }
 0x2b6   : > { %2514 = vmatmul.mubr.f32.gmra.mrb[46].mxu0 %v1131_v56 }
 0x34d   : > { %v2470_v12 = vpop.f32.mrb[16].mxu0 }
 0x34e   : > { %v1224_v27 = vadd.f32 %v2470_v12, %v3759_v14  ;;  %v1218_v8 = vpop.f32.mrb[17].mxu0 }
 0x34f   : > { %v1219_v22 = vadd.f32 %v1218_v8, %v3759_v14 }
 0x350   : > { %v1410_v30 = vmul.f32 0.70710677, %v1224_v27  ;;  %v1378_v54 = vmul.f32 0.5, %v1224_v27 }
 0x351   : > { %v1409_v31 = vmul.f32 0.70710677, %v1219_v22  ;;  %v2473_v35 = vpop.f32.mrb[18].mxu0  ;;  %v1377_v62 = vmul.f32 0.5, %v1219_v22 }
 0x352   : > { %2837 = verf.f32 %v1410_v30  ;;  %v1234_v16 = vadd.f32 %v2473_v35, %v3759_v14  ;;  %v1228_v23 = vpop.f32.mrb[19].mxu0 }
 0x353   : > { %2839 = verf.f32 %v1409_v31  ;;  %v1229_v36 = vadd.f32 %v1228_v23, %v3759_v14 }
 0x354   : > { %v1412_v9 = vmul.f32 0.70710677, %v1234_v16  ;;  %v1380_v47 = vmul.f32 0.5, %v1234_v16 }
 0x355   : > { %v1411_v52 = vmul.f32 0.70710677, %v1229_v36  ;;  %v2476_v37 = vpop.f32.mrb[20].mxu0  ;;  %v1379_v15 = vmul.f32 0.5, %v1229_v36 }
 0x356   : > { %2841 = verf.f32 %v1412_v9  ;;  %v3766_v60 = vadd.f32 %v2476_v37, %v3759_v14  ;;  %v1238_v5 = vpop.f32.mrb[21].mxu0 }
 0x357   : > { %2843 = verf.f32 %v1411_v52  ;;  %v1239_v13 = vadd.f32 %v1238_v5, %v3759_v14 }
 0x358   : > { %v1414_v41 = vmul.f32 0.70710677, %v3766_v60  ;;  %v1382_v30 = vmul.f32 0.5, %v3766_v60 }
 0x359   : > { %v1413_v38 = vmul.f32 0.70710677, %v1239_v13  ;;  %v2479_v44 = vpop.f32.mrb[22].mxu0  ;;  %v1381_v1 = vmul.f32 0.5, %v1239_v13 }
 0x35a   : > { %2845 = verf.f32 %v1414_v41  ;;  %v3771_v49 = vadd.f32 %v2479_v44, %v3759_v14  ;;  %v1248_v45 = vpop.f32.mrb[23].mxu0 }
 0x35b   : > { %2847 = verf.f32 %v1413_v38  ;;  %v1249_v58 = vadd.f32 %v1248_v45, %v3759_v14 }
 0x35c   : > { %v2838_v24 = vpop.eup %2837  ;;  %v1416_v34 = vmul.f32 0.70710677, %v3771_v49  ;;  %v1384_v44 = vmul.f32 0.5, %v3771_v49 }
 0x35d   : > { %v2840_v42 = vpop.eup %2839  ;;  %v1415_v57 = vmul.f32 0.70710677, %v1249_v58  ;;  %v2482_v20 = vpop.f32.mrb[24].mxu0  ;;  %v1474_v21 = vadd.f32 1.0, %v2838_v24  ;;  %v1383_v16 = vmul.f32 0.5, %v1249_v58 }
 0x35e   : > { %2849 = verf.f32 %v1416_v34  ;;  %v3776_v32 = vadd.f32 %v2482_v20, %v3759_v14  ;;  %v1258_v29 = vpop.f32.mrb[25].mxu0  ;;  %v1473_v50 = vadd.f32 1.0, %v2840_v42 }
 0x35f   : > { %2851 = verf.f32 %v1415_v57  ;;  %v1259_v28 = vadd.f32 %v1258_v29, %v3759_v14  ;;  %v3779_v3 = vmul.f32 %v1474_v21, %v1378_v54 }
 0x360   : > { %v2842_v40 = vpop.eup %2841  ;;  %v1418_v43 = vmul.f32 0.70710677, %v3776_v32  ;;  %v3786_v48 = vmul.f32 %v1473_v50, %v1377_v62 }
 0x361   : > { %v2844_v63 = vpop.eup %2843  ;;  %v1417_v55 = vmul.f32 0.70710677, %v1259_v28  ;;  %1539 = vadd.xlane.f32.xlu0 %v3779_v3  ;;  %v2485_v51 = vpop.f32.mrb[26].mxu0  ;;  %v1476_v7 = vadd.f32 1.0, %v2842_v40  ;;  %v1385_v24 = vmul.f32 0.5, %v1259_v28  ;;  %v1386_v40 = vmul.f32 0.5, %v3776_v32 }
 0x362   : > { %2853 = verf.f32 %v1418_v43  ;;  %v3784_v4 = vadd.f32 %v2485_v51, %v3759_v14  ;;  %v1268_v6 = vpop.f32.mrb[27].mxu0  ;;  %v1475_v25 = vadd.f32 1.0, %v2844_v63 }
 0x363   : > { %2855 = verf.f32 %v1417_v55  ;;  %v3789_v10 = vadd.f32 %v1268_v6, %v3759_v14  ;;  %v3791_v46 = vmul.f32 %v1476_v7, %v1380_v47 }
 0x364   : > { %v2846_v61 = vpop.eup %2845  ;;  %v1420_v11 = vmul.f32 0.70710677, %v3784_v4  ;;  %v3803_v56 = vmul.f32 %v1475_v25, %v1379_v15 }
 0x365   : > { %v2848_v59 = vpop.eup %2847  ;;  %v1419_v17 = vmul.f32 0.70710677, %v3789_v10  ;;  %1543 = vadd.xlane.f32.xlu1 %v3791_v46  ;;  %v2488_v2 = vpop.f32.mrb[28].mxu0  ;;  %1537 = vadd.xlane.f32.xlu0 %v3786_v48  ;;  %v1478_v33 = vadd.f32 1.0, %v2846_v61  ;;  %v1387_v63 = vmul.f32 0.5, %v3789_v10 }
 0x366   : > { %2857 = verf.f32 %v1420_v11  ;;  %v3798_v18 = vadd.f32 %v2488_v2, %v3759_v14  ;;  %v1278_v19 = vpop.f32.mrb[29].mxu0  ;;  %v1477_v0 = vadd.f32 1.0, %v2848_v59  ;;  %v1388_v59 = vmul.f32 0.5, %v3784_v4 }
 0x367   : > { %2859 = verf.f32 %v1419_v17  ;;  %v3801_v53 = vadd.f32 %v1278_v19, %v3759_v14  ;;  %v3818_v37 = vmul.f32 %v1478_v33, %v1382_v30 }
 0x368   : > { %v2850_v12 = vpop.eup %2849  ;;  %v1422_v27 = vmul.f32 0.70710677, %v3798_v18  ;;  %v3806_v8 = vmul.f32 %v1477_v0, %v1381_v1 }
 0x369   : > { %v2852_v22 = vpop.eup %2851  ;;  %v1421_v31 = vmul.f32 0.70710677, %v3801_v53  ;;  %v2491_v35 = vpop.f32.mrb[30].mxu0  ;;  %1541 = vadd.xlane.f32.xlu1 %v3803_v56  ;;  %v1480_v60 = vadd.f32 1.0, %v2850_v12  ;;  %v1389_v2 = vmul.f32 0.5, %v3801_v53 }
 0x36a   : > { %2861 = verf.f32 %v1422_v27  ;;  %v3812_v23 = vadd.f32 %v2491_v35, %v3759_v14  ;;  %v1288_v36 = vpop.f32.mrb[31].mxu0  ;;  %1545 = vadd.xlane.f32.xlu0 %v3806_v8  ;;  %v1479_v9 = vadd.f32 1.0, %v2852_v22 }
 0x36b   : > { %2863 = verf.f32 %v1421_v31  ;;  %v3816_v52 = vadd.f32 %v1288_v36, %v3759_v14  ;;  %v3833_v20 = vmul.f32 %v1480_v60, %v1384_v44  ;;  %v1390_v31 = vmul.f32 0.5, %v3798_v18 }
 0x36c   : > { %v2854_v5 = vpop.eup %2853  ;;  %v1424_v13 = vmul.f32 0.70710677, %v3812_v23  ;;  %v3821_v41 = vmul.f32 %v1479_v9, %v1383_v16 }
 0x36d   : > { %v2856_v38 = vpop.eup %2855  ;;  %v1423_v45 = vmul.f32 0.70710677, %v3816_v52  ;;  %v2494_v58 = vpop.f32.mrb[32].mxu0  ;;  %1547 = vadd.xlane.f32.xlu1 %v3818_v37  ;;  %v1482_v49 = vadd.f32 1.0, %v2854_v5  ;;  %v1391_v36 = vmul.f32 0.5, %v3816_v52 }
 0x36e   : > { %2865 = verf.f32 %v1424_v13  ;;  %v3827_v34 = vadd.f32 %v2494_v58, %v3759_v14  ;;  %v1298_v42 = vpop.f32.mrb[33].mxu0  ;;  %1549 = vadd.xlane.f32.xlu0 %v3821_v41  ;;  %v1481_v54 = vadd.f32 1.0, %v2856_v38 }
 0x36f   : > { %2867 = verf.f32 %v1423_v45  ;;  %v3831_v57 = vadd.f32 %v1298_v42, %v3759_v14  ;;  %v3849_v32 = vmul.f32 %v1482_v49, %v1386_v40 }
 0x370   : > { %v2858_v21 = vpop.eup %2857  ;;  %v1426_v29 = vmul.f32 0.70710677, %v3827_v34  ;;  %v3836_v50 = vmul.f32 %v1481_v54, %v1385_v24  ;;  %v1392_v24 = vmul.f32 0.5, %v3812_v23 }
 0x371   : > { %v2860_v28 = vpop.eup %2859  ;;  %v1425_v62 = vmul.f32 0.70710677, %v3831_v57  ;;  %v2497_v43 = vpop.f32.mrb[34].mxu0  ;;  %1551 = vadd.xlane.f32.xlu1 %v3833_v20  ;;  %v1484_v6 = vadd.f32 1.0, %v2858_v21  ;;  %v1393_v49 = vmul.f32 0.5, %v3831_v57 }
 0x372   : > { %2869 = verf.f32 %v1426_v29  ;;  %v3843_v47 = vadd.f32 %v2497_v43, %v3759_v14  ;;  %v1308_v55 = vpop.f32.mrb[35].mxu0  ;;  %1553 = vadd.xlane.f32.xlu0 %v3836_v50  ;;  %v1483_v51 = vadd.f32 1.0, %v2860_v28 }
 0x373   : > { %2871 = verf.f32 %v1425_v62  ;;  %v3847_v7 = vadd.f32 %v1308_v55, %v3759_v14  ;;  %v3865_v4 = vmul.f32 %v1484_v6, %v1388_v59 }
 0x374   : > { %v2862_v25 = vpop.eup %2861  ;;  %v1428_v61 = vmul.f32 0.70710677, %v3843_v47  ;;  %v3852_v11 = vmul.f32 %v1483_v51, %v1387_v63  ;;  %v1394_v51 = vmul.f32 0.5, %v3827_v34 }
 0x375   : > { %v2864_v10 = vpop.eup %2863  ;;  %v1427_v15 = vmul.f32 0.70710677, %v3847_v7  ;;  %v2500_v17 = vpop.f32.mrb[36].mxu0  ;;  %1555 = vadd.xlane.f32.xlu1 %v3849_v32  ;;  %v1486_v12 = vadd.f32 1.0, %v2862_v25 }
 0x376   : > { %2873 = verf.f32 %v1428_v61  ;;  %v3859_v1 = vadd.f32 %v2500_v17, %v3759_v14  ;;  %v1318_v19 = vpop.f32.mrb[37].mxu0  ;;  %1557 = vadd.xlane.f32.xlu0 %v3852_v11  ;;  %v1485_v0 = vadd.f32 1.0, %v2864_v10  ;;  %v1395_v61 = vmul.f32 0.5, %v3847_v7 }
 0x377   : > { %2875 = verf.f32 %v1427_v15  ;;  %v3863_v33 = vadd.f32 %v1318_v19, %v3759_v14  ;;  %v3881_v18 = vmul.f32 %v1486_v12, %v1390_v31 }
 0x378   : > { %v2866_v27 = vpop.eup %2865  ;;  %v1430_v22 = vmul.f32 0.70710677, %v3859_v1  ;;  %v3868_v30 = vmul.f32 %v1485_v0, %v1389_v2 }
 0x379   : > { %v2868_v53 = vpop.eup %2867  ;;  %v1429_v35 = vmul.f32 0.70710677, %v3863_v33  ;;  %v2503_v16 = vpop.f32.mrb[38].mxu0  ;;  %1559 = vadd.xlane.f32.xlu1 %v3865_v4  ;;  %v1488_v38 = vadd.f32 1.0, %v2866_v27  ;;  %v1396_v27 = vmul.f32 0.5, %v3843_v47  ;;  %v1397_v31 = vmul.f32 0.5, %v3863_v33 }
 0x37a   : > { %2877 = verf.f32 %v1430_v22  ;;  %v3875_v9 = vadd.f32 %v2503_v16, %v3759_v14  ;;  %v1328_v60 = vpop.f32.mrb[39].mxu0  ;;  %1561 = vadd.xlane.f32.xlu0 %v3868_v30  ;;  %v1487_v5 = vadd.f32 1.0, %v2868_v53  ;;  %v1398_v33 = vmul.f32 0.5, %v3859_v1 }
 0x37b   : > { %2879 = verf.f32 %v1429_v35  ;;  %v3879_v13 = vadd.f32 %v1328_v60, %v3759_v14  ;;  %v3897_v23 = vmul.f32 %v1488_v38, %v1392_v24 }
 0x37c   : > { %v2870_v44 = vpop.eup %2869  ;;  %v1432_v45 = vmul.f32 0.70710677, %v3875_v9  ;;  %v3884_v58 = vmul.f32 %v1487_v5, %v1391_v36 }
 0x37d   : > { %v2872_v52 = vpop.eup %2871  ;;  %v1431_v42 = vmul.f32 0.70710677, %v3879_v13  ;;  %v2506_v54 = vpop.f32.mrb[40].mxu0  ;;  %1563 = vadd.xlane.f32.xlu1 %v3881_v18  ;;  %v1490_v62 = vadd.f32 1.0, %v2870_v44 }
 0x37e   : > { %2881 = verf.f32 %v1432_v45  ;;  %v3891_v21 = vadd.f32 %v2506_v54, %v3759_v14  ;;  %v1338_v29 = vpop.f32.mrb[41].mxu0  ;;  %1565 = vadd.xlane.f32.xlu0 %v3884_v58  ;;  %v1489_v28 = vadd.f32 1.0, %v2872_v52  ;;  %v1399_v54 = vmul.f32 0.5, %v3879_v13 }
 0x37f   : > { %2883 = verf.f32 %v1431_v42  ;;  %v3895_v40 = vadd.f32 %v1338_v29, %v3759_v14  ;;  %v3911_v2 = vmul.f32 %v1490_v62, %v1394_v51  ;;  %v1400_v13 = vmul.f32 0.5, %v3875_v9 }
 0x380   : > { %v2874_v43 = vpop.eup %2873  ;;  %v1434_v63 = vmul.f32 0.70710677, %v3891_v21  ;;  %v3900_v55 = vmul.f32 %v1489_v28, %v1393_v49 }
 0x381   : > { %v2876_v57 = vpop.eup %2875  ;;  %v1433_v6 = vmul.f32 0.70710677, %v3895_v40  ;;  %v2509_v25 = vpop.f32.mrb[42].mxu0  ;;  %1567 = vadd.xlane.f32.xlu1 %v3897_v23  ;;  %v1492_v34 = vadd.f32 1.0, %v2874_v43 }
 0x382   : > { %2885 = verf.f32 %v1434_v63  ;;  %v3907_v10 = vadd.f32 %v2509_v25, %v3759_v14  ;;  %v1348_v59 = vpop.f32.mrb[43].mxu0  ;;  %1569 = vadd.xlane.f32.xlu0 %v3900_v55  ;;  %v1491_v15 = vadd.f32 1.0, %v2876_v57 }
 0x383   : > { %2887 = verf.f32 %v1433_v6  ;;  %v1349_v17 = vadd.f32 %v1348_v59, %v3759_v14  ;;  %v3922_v5 = vmul.f32 %v1492_v34, %v1396_v27 }
 0x384   : > { %v2878_v19 = vpop.eup %2877  ;;  %v1436_v0 = vmul.f32 0.70710677, %v3907_v10  ;;  %v3914_v12 = vmul.f32 %v1491_v15, %v1395_v61  ;;  %v1401_v61 = vmul.f32 0.5, %v3895_v40 }
 0x385   : > { %v2880_v7 = vpop.eup %2879  ;;  %v1435_v22 = vmul.f32 0.70710677, %v1349_v17  ;;  %v2512_v53 = vpop.f32.mrb[44].mxu0  ;;  %1571 = vadd.xlane.f32.xlu1 %v3911_v2  ;;  %v1494_v38 = vadd.f32 1.0, %v2878_v19  ;;  %v1403_v9 = vmul.f32 0.5, %v1349_v17 }
 0x386   : > { %2889 = verf.f32 %v1436_v0  ;;  %v1364_v35 = vadd.f32 %v2512_v53, %v3759_v14  ;;  %v1358_v16 = vpop.f32.mrb[45].mxu0  ;;  %1573 = vadd.xlane.f32.xlu0 %v3914_v12  ;;  %v1493_v36 = vadd.f32 1.0, %v2880_v7  ;;  %v1402_v7 = vmul.f32 0.5, %v3891_v21 }
 0x387   : > { %2891 = verf.f32 %v1435_v22  ;;  %v1359_v60 = vadd.f32 %v1358_v16, %v3759_v14  ;;  %v3932_v43 = vmul.f32 %v1494_v38, %v1398_v33 }
 0x388   : > { %v2882_v47 = vpop.eup %2881  ;;  %v1438_v44 = vmul.f32 0.70710677, %v1364_v35  ;;  %v3924_v45 = vmul.f32 %v1493_v36, %v1397_v31  ;;  %v1404_v36 = vmul.f32 0.5, %v3907_v10 }
 0x389   : > { %v2884_v52 = vpop.eup %2883  ;;  %v1437_v24 = vmul.f32 0.70710677, %v1359_v60  ;;  %v2515_v42 = vpop.f32.mrb[46].mxu0  ;;  %1575 = vadd.xlane.f32.xlu1 %v3922_v5  ;;  %v1496_v63 = vadd.f32 1.0, %v2882_v47  ;;  %v1405_v38 = vmul.f32 0.5, %v1359_v60 }
 0x38a   : > { %2893 = verf.f32 %v1438_v44  ;;  %v1374_v49 = vadd.f32 %v2515_v42, %v3759_v14  ;;  %v1368_v29 = vpop.f32.mrb[47].mxu0  ;;  %1577 = vadd.xlane.f32.xlu0 %v3924_v45  ;;  %v1495_v28 = vadd.f32 1.0, %v2884_v52 }
 0x38b   : > { %2895 = verf.f32 %v1437_v24  ;;  %v1369_v62 = vadd.f32 %v1368_v29, %v3759_v14  ;;  %v3940_v14 = vmul.f32 %v1496_v63, %v1400_v13  ;;  %v1406_v24 = vmul.f32 0.5, %v1364_v35 }
 0x38c   : > { %v2886_v1 = vpop.eup %2885  ;;  %v1440_v57 = vmul.f32 0.70710677, %v1374_v49  ;;  %v3934_v51 = vmul.f32 %v1495_v28, %v1399_v54  ;;  %v1408_v28 = vmul.f32 0.5, %v1374_v49 }
 0x38d   : > { %v2888_v6 = vpop.eup %2887  ;;  %v1439_v25 = vmul.f32 0.70710677, %v1369_v62  ;;  %1579 = vadd.xlane.f32.xlu1 %v3932_v43  ;;  %v1498_v15 = vadd.f32 1.0, %v2886_v1  ;;  %v1407_v42 = vmul.f32 0.5, %v1369_v62 }
 0x38e   : > { %2897 = verf.f32 %v1440_v57  ;;  %1581 = vadd.xlane.f32.xlu0 %v3934_v51  ;;  %v1497_v59 = vadd.f32 1.0, %v2888_v6 }
 0x38f   : > { %2899 = verf.f32 %v1439_v25  ;;  %v3947_v27 = vmul.f32 %v1498_v15, %v1402_v7 }
 0x390   : > { %v2890_v34 = vpop.eup %2889  ;;  %v3942_v19 = vmul.f32 %v1497_v59, %v1401_v61 }
 0x391   : > { %v2892_v0 = vpop.eup %2891  ;;  %1583 = vadd.xlane.f32.xlu1 %v3940_v14  ;;  %v1500_v22 = vadd.f32 1.0, %v2890_v34 }
 0x392   : > { %1585 = vadd.xlane.f32.xlu0 %v3942_v19  ;;  %v1499_v40 = vadd.f32 1.0, %v2892_v0 }
 0x393   : > { %v3954_v47 = vmul.f32 %v1500_v22, %v1404_v36 }
 0x394   : > { %v2894_v53 = vpop.eup %2893  ;;  %v3949_v31 = vmul.f32 %v1499_v40, %v1403_v9 }
 0x395   : > { %v2896_v16 = vpop.eup %2895  ;;  %1587 = vadd.xlane.f32.xlu1 %v3947_v27  ;;  %v1502_v17 = vadd.f32 1.0, %v2894_v53 }
 0x396   : > { %1589 = vadd.xlane.f32.xlu0 %v3949_v31  ;;  %v1501_v21 = vadd.f32 1.0, %v2896_v16 }
 0x397   : > { %v3960_v54 = vmul.f32 %v1502_v17, %v1406_v24 }
 0x398   : > { %v2898_v44 = vpop.eup %2897  ;;  %v3956_v52 = vmul.f32 %v1501_v21, %v1405_v38 }
 0x399   : > { %v2900_v33 = vpop.eup %2899  ;;  %1591 = vadd.xlane.f32.xlu1 %v3954_v47  ;;  %v1504_v60 = vadd.f32 1.0, %v2898_v44 }
 0x39a   : > { %1593 = vadd.xlane.f32.xlu0 %v3956_v52  ;;  %v1503_v10 = vadd.f32 1.0, %v2900_v33 }
 0x39b   : > { %v3966_v63 = vmul.f32 %v1504_v60, %v1408_v28 }
 0x39c   : > { %v3962_v29 = vmul.f32 %v1503_v10, %v1407_v42 }
 0x39d   : > { %1595 = vadd.xlane.f32.xlu1 %v3960_v54 }
 0x39e   : > { %1597 = vadd.xlane.f32.xlu0 %v3962_v29 }
 0x3a1   : > { %1599 = vadd.xlane.f32.xlu1 %v3966_v63 }
 0x3ee   : > { %v1540_v35 = vpop.xlane.xlu0 %1539 }
 0x3ef   : > { %v1603_v1 = vmul.f32 0.0078125, %v1540_v35 }
 0x3f1   : > { %v3970_v62 = vsub.f32 %v3779_v3, %v1603_v1 }
 0x3f2   : > { %v1544_v57 = vpop.xlane.xlu1 %1543  ;;  %v1538_v6 = vpop.xlane.xlu0 %1537 }
 0x3f3   : > { %v1605_v13 = vmul.f32 0.0078125, %v1544_v57  ;;  %v1602_v25 = vmul.f32 0.0078125, %v1538_v6  ;;  %v1667_v49 = vmul.f32 %v3970_v62, %v3970_v62 }
 0x3f5   : > { %v3975_v61 = vsub.f32 %v3791_v46, %v1605_v13  ;;  %v3978_v59 = vsub.f32 %v3786_v48, %v1602_v25  ;;  %1700 = vadd.xlane.f32.xlu1 %v1667_v49 }
 0x3f6   : > { %v1542_v15 = vpop.xlane.xlu1 %1541 }
 0x3f7   : > { %v1604_v34 = vmul.f32 0.0078125, %v1542_v15  ;;  %v1546_v0 = vpop.xlane.xlu0 %1545  ;;  %v1669_v3 = vmul.f32 %v3975_v61, %v3975_v61  ;;  %v1666_v7 = vmul.f32 %v3978_v59, %v3978_v59 }
 0x3f8   : > { %v1606_v9 = vmul.f32 0.0078125, %v1546_v0 }
 0x3f9   : > { %v3985_v40 = vsub.f32 %v3803_v56, %v1604_v34  ;;  %1704 = vadd.xlane.f32.xlu1 %v1669_v3  ;;  %1698 = vadd.xlane.f32.xlu0 %v1666_v7 }
 0x3fa   : > { %v1548_v46 = vpop.xlane.xlu1 %1547  ;;  %v3988_v48 = vsub.f32 %v3806_v8, %v1606_v9 }
 0x3fb   : > { %v1607_v22 = vmul.f32 0.0078125, %v1548_v46  ;;  %v1550_v53 = vpop.xlane.xlu0 %1549  ;;  %v1668_v16 = vmul.f32 %v3985_v40, %v3985_v40 }
 0x3fc   : > { %v1608_v36 = vmul.f32 0.0078125, %v1550_v53  ;;  %v1670_v33 = vmul.f32 %v3988_v48, %v3988_v48 }
 0x3fd   : > { %v3993_v38 = vsub.f32 %v3818_v37, %v1607_v22  ;;  %1702 = vadd.xlane.f32.xlu0 %v1668_v16 }
 0x3fe   : > { %v1552_v21 = vpop.xlane.xlu1 %1551  ;;  %v3996_v56 = vsub.f32 %v3821_v41, %v1608_v36 }
 0x3ff   : > { %v1609_v17 = vmul.f32 0.0078125, %v1552_v21  ;;  %v1554_v44 = vpop.xlane.xlu0 %1553  ;;  %v1671_v8 = vmul.f32 %v3993_v38, %v3993_v38 }
 0x400   : > { %v1610_v24 = vmul.f32 0.0078125, %v1554_v44  ;;  %v1672_v35 = vmul.f32 %v3996_v56, %v3996_v56 }
 0x401   : > { %v4003_v42 = vsub.f32 %v3833_v20, %v1609_v17  ;;  %1708 = vadd.xlane.f32.xlu1 %v1671_v8  ;;  %1706 = vadd.xlane.f32.xlu0 %v1670_v33 }
 0x402   : > { %v1556_v37 = vpop.xlane.xlu1 %1555  ;;  %v4006_v10 = vsub.f32 %v3836_v50, %v1610_v24 }
 0x403   : > { %v1611_v41 = vmul.f32 0.0078125, %v1556_v37  ;;  %v1558_v60 = vpop.xlane.xlu0 %1557  ;;  %v1673_v28 = vmul.f32 %v4003_v42, %v4003_v42 }
 0x404   : > { %v1612_v1 = vmul.f32 0.0078125, %v1558_v60  ;;  %v1674_v49 = vmul.f32 %v4006_v10, %v4006_v10 }
 0x405   : > { %v4013_v57 = vsub.f32 %v3849_v32, %v1611_v41  ;;  %1712 = vadd.xlane.f32.xlu1 %v1673_v28  ;;  %1710 = vadd.xlane.f32.xlu0 %v1672_v35 }
 0x406   : > { %v1560_v20 = vpop.xlane.xlu1 %1559  ;;  %v4016_v6 = vsub.f32 %v3852_v11, %v1612_v1 }
 0x407   : > { %v1613_v50 = vmul.f32 0.0078125, %v1560_v20  ;;  %v1562_v13 = vpop.xlane.xlu0 %1561  ;;  %v1675_v25 = vmul.f32 %v4013_v57, %v4013_v57 }
 0x408   : > { %v1614_v15 = vmul.f32 0.0078125, %v1562_v13  ;;  %v1676_v9 = vmul.f32 %v4016_v6, %v4016_v6 }
 0x409   : > { %v4023_v34 = vsub.f32 %v3865_v4, %v1613_v50  ;;  %1716 = vadd.xlane.f32.xlu1 %v1675_v25  ;;  %1714 = vadd.xlane.f32.xlu0 %v1674_v49 }
 0x40a   : > { %v1564_v32 = vpop.xlane.xlu1 %1563  ;;  %v4026_v0 = vsub.f32 %v3868_v30, %v1614_v15 }
 0x40b   : > { %v1615_v11 = vmul.f32 0.0078125, %v1564_v32  ;;  %v1566_v3 = vpop.xlane.xlu0 %1565  ;;  %v1677_v7 = vmul.f32 %v4023_v34, %v4023_v34 }
 0x40c   : > { %v1616_v46 = vmul.f32 0.0078125, %v1566_v3  ;;  %v1678_v21 = vmul.f32 %v4026_v0, %v4026_v0 }
 0x40d   : > { %v4033_v22 = vsub.f32 %v3881_v18, %v1615_v11  ;;  %1720 = vadd.xlane.f32.xlu1 %v1677_v7  ;;  %1718 = vadd.xlane.f32.xlu0 %v1676_v9 }
 0x40e   : > { %v1568_v4 = vpop.xlane.xlu1 %1567  ;;  %v4036_v53 = vsub.f32 %v3884_v58, %v1616_v46 }
 0x40f   : > { %v1617_v30 = vmul.f32 0.0078125, %v1568_v4  ;;  %v1570_v16 = vpop.xlane.xlu0 %1569  ;;  %v1679_v36 = vmul.f32 %v4033_v22, %v4033_v22 }
 0x410   : > { %v1618_v17 = vmul.f32 0.0078125, %v1570_v16  ;;  %v1680_v37 = vmul.f32 %v4036_v53, %v4036_v53 }
 0x411   : > { %v4043_v44 = vsub.f32 %v3897_v23, %v1617_v30  ;;  %1724 = vadd.xlane.f32.xlu1 %v1679_v36  ;;  %1722 = vadd.xlane.f32.xlu0 %v1678_v21 }
 0x412   : > { %v1572_v18 = vpop.xlane.xlu1 %1571  ;;  %v4046_v8 = vsub.f32 %v3900_v55, %v1618_v17 }
 0x413   : > { %v1619_v58 = vmul.f32 0.0078125, %v1572_v18  ;;  %v1574_v33 = vpop.xlane.xlu0 %1573  ;;  %v1681_v24 = vmul.f32 %v4043_v44, %v4043_v44 }
 0x414   : > { %v1620_v41 = vmul.f32 0.0078125, %v1574_v33  ;;  %v1682_v20 = vmul.f32 %v4046_v8, %v4046_v8 }
 0x415   : > { %v4053_v60 = vsub.f32 %v3911_v2, %v1619_v58  ;;  %1728 = vadd.xlane.f32.xlu1 %v1681_v24  ;;  %1726 = vadd.xlane.f32.xlu0 %v1680_v37 }
 0x416   : > { %v1576_v23 = vpop.xlane.xlu1 %1575  ;;  %v4056_v28 = vsub.f32 %v3914_v12, %v1620_v41 }
 0x417   : > { %v1621_v55 = vmul.f32 0.0078125, %v1576_v23  ;;  %v1578_v35 = vpop.xlane.xlu0 %1577  ;;  %v1683_v1 = vmul.f32 %v4053_v60, %v4053_v60 }
 0x418   : > { %v1622_v50 = vmul.f32 0.0078125, %v1578_v35  ;;  %v1684_v32 = vmul.f32 %v4056_v28, %v4056_v28 }
 0x419   : > { %v4063_v13 = vsub.f32 %v3922_v5, %v1621_v55  ;;  %1732 = vadd.xlane.f32.xlu1 %v1683_v1  ;;  %1730 = vadd.xlane.f32.xlu0 %v1682_v20 }
 0x41a   : > { %v1580_v2 = vpop.xlane.xlu1 %1579  ;;  %v4066_v25 = vsub.f32 %v3924_v45, %v1622_v50 }
 0x41b   : > { %v1623_v12 = vmul.f32 0.0078125, %v1580_v2  ;;  %v1582_v49 = vpop.xlane.xlu0 %1581  ;;  %v1685_v15 = vmul.f32 %v4063_v13, %v4063_v13 }
 0x41c   : > { %v1624_v11 = vmul.f32 0.0078125, %v1582_v49  ;;  %v1686_v4 = vmul.f32 %v4066_v25, %v4066_v25 }
 0x41d   : > { %v4073_v3 = vsub.f32 %v3932_v43, %v1623_v12  ;;  %1736 = vadd.xlane.f32.xlu1 %v1685_v15  ;;  %1734 = vadd.xlane.f32.xlu0 %v1684_v32 }
 0x41e   : > { %v1584_v5 = vpop.xlane.xlu1 %1583  ;;  %v4076_v7 = vsub.f32 %v3934_v51, %v1624_v11 }
 0x41f   : > { %v1625_v45 = vmul.f32 0.0078125, %v1584_v5  ;;  %v1586_v9 = vpop.xlane.xlu0 %1585  ;;  %v1687_v46 = vmul.f32 %v4073_v3, %v4073_v3 }
 0x420   : > { %v1626_v30 = vmul.f32 0.0078125, %v1586_v9  ;;  %v1688_v18 = vmul.f32 %v4076_v7, %v4076_v7 }
 0x421   : > { %v4083_v16 = vsub.f32 %v3940_v14, %v1625_v45  ;;  %1740 = vadd.xlane.f32.xlu1 %v1687_v46  ;;  %1738 = vadd.xlane.f32.xlu0 %v1686_v4 }
 0x422   : > { %v1588_v43 = vpop.xlane.xlu1 %1587  ;;  %v4086_v36 = vsub.f32 %v3942_v19, %v1626_v30 }
 0x423   : > { %v1627_v51 = vmul.f32 0.0078125, %v1588_v43  ;;  %v1590_v21 = vpop.xlane.xlu0 %1589  ;;  %v1689_v17 = vmul.f32 %v4083_v16, %v4083_v16 }
 0x424   : > { %v1628_v58 = vmul.f32 0.0078125, %v1590_v21  ;;  %v1690_v23 = vmul.f32 %v4086_v36, %v4086_v36 }
 0x425   : > { %v4093_v33 = vsub.f32 %v3947_v27, %v1627_v51  ;;  %1744 = vadd.xlane.f32.xlu1 %v1689_v17  ;;  %1742 = vadd.xlane.f32.xlu0 %v1688_v18 }
 0x426   : > { %v1592_v14 = vpop.xlane.xlu1 %1591  ;;  %v4096_v24 = vsub.f32 %v3949_v31, %v1628_v58  ;;  %v1892_v58 = vsub.s32 3, %v3452_v26 }
 0x427   : > { %v1629_v19 = vmul.f32 0.0078125, %v1592_v14  ;;  %v1594_v37 = vpop.xlane.xlu0 %1593  ;;  %v1691_v41 = vmul.f32 %v4093_v33, %v4093_v33 }
 0x428   : > { %v1630_v55 = vmul.f32 0.0078125, %v1594_v37  ;;  %v1692_v2 = vmul.f32 %v4096_v24, %v4096_v24 }
 0x429   : > { %v4103_v35 = vsub.f32 %v3954_v47, %v1629_v19  ;;  %1748 = vadd.xlane.f32.xlu1 %v1691_v41  ;;  %1746 = vadd.xlane.f32.xlu0 %v1690_v23  ;;  %v1928_v19 = vsub.s32 4, %v3452_v26 }
 0x42a   : > { %v1596_v27 = vpop.xlane.xlu1 %1595  ;;  %v4106_v1 = vsub.f32 %v3956_v52, %v1630_v55 }
 0x42b   : > { %v1631_v31 = vmul.f32 0.0078125, %v1596_v27  ;;  %v1598_v20 = vpop.xlane.xlu0 %1597  ;;  %v1693_v50 = vmul.f32 %v4103_v35, %v4103_v35  ;;  %v4132_v27 = vrot.slane %v3756_v39, %v1892_v58 }
 0x42c   : > { %v1632_v12 = vmul.f32 0.0078125, %v1598_v20  ;;  %v1694_v11 = vmul.f32 %v4106_v1, %v4106_v1 }
 0x42d   : > { %v4113_v49 = vsub.f32 %v3960_v54, %v1631_v31  ;;  %1752 = vadd.xlane.f32.xlu1 %v1693_v50  ;;  %1750 = vadd.xlane.f32.xlu0 %v1692_v2  ;;  %v4135_v2 = vrot.slane %v3756_v39, %v1928_v19 }
 0x42e   : > { %v1600_v47 = vpop.xlane.xlu1 %1599  ;;  %v4116_v15 = vsub.f32 %v3962_v29, %v1632_v12 }
 0x42f   : > { %v1633_v52 = vmul.f32 0.0078125, %v1600_v47  ;;  %v1695_v32 = vmul.f32 %v4113_v49, %v4113_v49 }
 0x430   : > { %v1696_v45 = vmul.f32 %v4116_v15, %v4116_v15 }
 0x431   : > { %v4123_v5 = vsub.f32 %v3966_v63, %v1633_v52  ;;  %1756 = vadd.xlane.f32.xlu1 %v1695_v32  ;;  %1754 = vadd.xlane.f32.xlu0 %v1694_v11 }
 0x433   : > { %v1697_v54 = vmul.f32 %v4123_v5, %v4123_v5 }
 0x435   : > { %1760 = vadd.xlane.f32.xlu1 %v1697_v54  ;;  %1758 = vadd.xlane.f32.xlu0 %v1696_v45 }
 0x482   : > { %v1701_v29 = vpop.xlane.xlu1 %1700 }
 0x483   : > { %v1763_v9 = vmul.f32 0.0078125, %v1701_v29 }
 0x485   : > { %v1795_v46 = vadd.f32 1e-05, %v1763_v9 }
 0x486   : > { %v1705_v4 = vpop.xlane.xlu1 %1704  ;;  %v1699_v30 = vpop.xlane.xlu0 %1698 }
 0x487   : > { %2901 = vrsqrt.f32 %v1795_v46  ;;  %v1765_v43 = vmul.f32 0.0078125, %v1705_v4  ;;  %v1762_v51 = vmul.f32 0.0078125, %v1699_v30 }
 0x489   : > { %v1797_v63 = vadd.f32 1e-05, %v1765_v43  ;;  %v1794_v21 = vadd.f32 1e-05, %v1762_v51 }
 0x48a   : > { %v1703_v17 = vpop.xlane.xlu0 %1702 }
 0x48b   : > { %2903 = vrsqrt.f32 %v1797_v63  ;;  %v1764_v18 = vmul.f32 0.0078125, %v1703_v17 }
 0x48c   : > { %2905 = vrsqrt.f32 %v1794_v21 }
 0x48d   : > { %v1796_v14 = vadd.f32 1e-05, %v1764_v18 }
 0x48e   : > { %v1709_v37 = vpop.xlane.xlu1 %1708  ;;  %v1707_v41 = vpop.xlane.xlu0 %1706 }
 0x48f   : > { %2907 = vrsqrt.f32 %v1796_v14  ;;  %v1767_v23 = vmul.f32 0.0078125, %v1709_v37  ;;  %v1766_v55 = vmul.f32 0.0078125, %v1707_v41 }
 0x491   : > { %v2902_v31 = vpop.eup %2901  ;;  %v1799_v20 = vadd.f32 1e-05, %v1767_v23  ;;  %v1798_v50 = vadd.f32 1e-05, %v1766_v55 }
 0x492   : > { %v1859_v12 = vmul.f32 %v2902_v31, %v3970_v62  ;;  %v1713_v47 = vpop.xlane.xlu1 %1712  ;;  %v1711_v52 = vpop.xlane.xlu0 %1710 }
 0x493   : > { %2909 = vrsqrt.f32 %v1799_v20  ;;  %v1769_v26 = vmul.f32 0.0078125, %v1713_v47  ;;  %v1768_v32 = vmul.f32 0.0078125, %v1711_v52 }
 0x494   : > { %v1895_v11 = vmul.f32 %v4132_v27, %v1859_v12  ;;  %2911 = vrsqrt.f32 %v1798_v50 }
 0x495   : > { %v2904_v54 = vpop.eup %2903  ;;  %v1801_v45 = vadd.f32 1e-05, %v1769_v26  ;;  %v1800_v29 = vadd.f32 1e-05, %v1768_v32 }
 0x496   : > { %v2906_v9 = vpop.eup %2905  ;;  %v1931_v46 = vadd.f32 %v4135_v2, %v1895_v11  ;;  %v1861_v39 = vmul.f32 %v2904_v54, %v3975_v61  ;;  %v1717_v4 = vpop.xlane.xlu1 %1716 }
 0x497   : > { %v1715_v30 = vpop.xlane.xlu0 %1714  ;;  %v1858_v62 = vmul.f32 %v2906_v9, %v3978_v59  ;;  %2913 = vrsqrt.f32 %v1801_v45  ;;  %v1771_v43 = vmul.f32 0.0078125, %v1717_v4 }
 0x498   : > { %v1770_v51 = vmul.f32 0.0078125, %v1715_v30  ;;  %1963 = vst [vmem:[%s4144_s13 + $0x8] sm:$0xff] %v1931_v46  ;;  %v1897_v63 = vmul.f32 %v4132_v27, %v1861_v39  ;;  %2915 = vrsqrt.f32 %v1800_v29 }
 0x499   : > { %v2908_v21 = vpop.eup %2907  ;;  %v1894_v61 = vmul.f32 %v4132_v27, %v1858_v62  ;;  %v1803_v17 = vadd.f32 1e-05, %v1771_v43 }
 0x49a   : > { %v1802_v18 = vadd.f32 1e-05, %v1770_v51  ;;  %v1933_v59 = vadd.f32 %v4135_v2, %v1897_v63  ;;  %v1860_v58 = vmul.f32 %v2908_v21, %v3985_v40  ;;  %v1721_v14 = vpop.xlane.xlu1 %1720 }
 0x49b   : > { %v1719_v19 = vpop.xlane.xlu0 %1718  ;;  %v1930_v37 = vadd.f32 %v4135_v2, %v1894_v61  ;;  %2917 = vrsqrt.f32 %v1803_v17  ;;  %v1773_v41 = vmul.f32 0.0078125, %v1721_v14 }
 0x49c   : > { %v1772_v23 = vmul.f32 0.0078125, %v1719_v19  ;;  %1965 = vst [vmem:[%s4144_s13 + $0x18] sm:$0xff] %v1933_v59  ;;  %v1896_v55 = vmul.f32 %v4132_v27, %v1860_v58  ;;  %2919 = vrsqrt.f32 %v1802_v18 }
 0x49d   : > { %v2910_v31 = vpop.eup %2909  ;;  %1962 = vst [vmem:[%s4144_s13] sm:$0xff] %v1930_v37  ;;  %v1805_v20 = vadd.f32 1e-05, %v1773_v41 }
 0x49e   : > { %v1804_v50 = vadd.f32 1e-05, %v1772_v23  ;;  %v2912_v12 = vpop.eup %2911  ;;  %v1932_v47 = vadd.f32 %v4135_v2, %v1896_v55  ;;  %v1863_v40 = vmul.f32 %v2910_v31, %v3993_v38  ;;  %v1725_v52 = vpop.xlane.xlu1 %1724 }
 0x49f   : > { %v1723_v26 = vpop.xlane.xlu0 %1722  ;;  %v1862_v32 = vmul.f32 %v2912_v12, %v3988_v48  ;;  %2921 = vrsqrt.f32 %v1805_v20  ;;  %v1775_v11 = vmul.f32 0.0078125, %v1725_v52 }
 0x4a0   : > { %v1774_v54 = vmul.f32 0.0078125, %v1723_v26  ;;  %1964 = vst [vmem:[%s4144_s13 + $0x10] sm:$0xff] %v1932_v47  ;;  %v1899_v45 = vmul.f32 %v4132_v27, %v1863_v40  ;;  %2923 = vrsqrt.f32 %v1804_v50 }
 0x4a1   : > { %v2914_v29 = vpop.eup %2913  ;;  %v1898_v9 = vmul.f32 %v4132_v27, %v1862_v32  ;;  %v1807_v46 = vadd.f32 1e-05, %v1775_v11 }
 0x4a2   : > { %v1806_v39 = vadd.f32 1e-05, %v1774_v54  ;;  %v2916_v4 = vpop.eup %2915  ;;  %v1935_v38 = vadd.f32 %v4135_v2, %v1899_v45  ;;  %v1865_v30 = vmul.f32 %v2914_v29, %v4003_v42  ;;  %v1729_v48 = vpop.xlane.xlu1 %1728 }
 0x4a3   : > { %v1727_v62 = vpop.xlane.xlu0 %1726  ;;  %v1934_v43 = vadd.f32 %v4135_v2, %v1898_v9  ;;  %v1864_v51 = vmul.f32 %v2916_v4, %v3996_v56  ;;  %2925 = vrsqrt.f32 %v1807_v46  ;;  %v1777_v63 = vmul.f32 0.0078125, %v1729_v48 }
 0x4a4   : > { %1967 = vst [vmem:[%s4144_s13 + $0x28] sm:$0xff] %v1935_v38  ;;  %v1901_v21 = vmul.f32 %v4132_v27, %v1865_v30  ;;  %2927 = vrsqrt.f32 %v1806_v39  ;;  %v1776_v61 = vmul.f32 0.0078125, %v1727_v62 }
 0x4a5   : > { %v2918_v17 = vpop.eup %2917  ;;  %1966 = vst [vmem:[%s4144_s13 + $0x20] sm:$0xff] %v1934_v43  ;;  %v1900_v18 = vmul.f32 %v4132_v27, %v1864_v51  ;;  %v1809_v59 = vadd.f32 1e-05, %v1777_v63 }
 0x4a6   : > { %v2920_v42 = vpop.eup %2919  ;;  %v1937_v58 = vadd.f32 %v4135_v2, %v1901_v21  ;;  %v1867_v14 = vmul.f32 %v2918_v17, %v4013_v57  ;;  %v1808_v56 = vadd.f32 1e-05, %v1776_v61  ;;  %v1733_v19 = vpop.xlane.xlu1 %1732 }
 0x4a7   : > { %v1731_v37 = vpop.xlane.xlu0 %1730  ;;  %v1936_v41 = vadd.f32 %v4135_v2, %v1900_v18  ;;  %v1866_v23 = vmul.f32 %v2920_v42, %v4006_v10  ;;  %2929 = vrsqrt.f32 %v1809_v59  ;;  %v1779_v55 = vmul.f32 0.0078125, %v1733_v19 }
 0x4a8   : > { %1969 = vst [vmem:[%s4144_s13 + $0x38] sm:$0xff] %v1937_v58  ;;  %v1903_v31 = vmul.f32 %v4132_v27, %v1867_v14  ;;  %2931 = vrsqrt.f32 %v1808_v56  ;;  %v1778_v20 = vmul.f32 0.0078125, %v1731_v37 }
 0x4a9   : > { %v2922_v50 = vpop.eup %2921  ;;  %1968 = vst [vmem:[%s4144_s13 + $0x30] sm:$0xff] %v1936_v41  ;;  %v1902_v12 = vmul.f32 %v4132_v27, %v1866_v23  ;;  %v1811_v57 = vadd.f32 1e-05, %v1779_v55 }
 0x4aa   : > { %v2924_v47 = vpop.eup %2923  ;;  %v1939_v40 = vadd.f32 %v4135_v2, %v1903_v31  ;;  %v1869_v52 = vmul.f32 %v2922_v50, %v4023_v34  ;;  %v1810_v10 = vadd.f32 1e-05, %v1778_v20  ;;  %v1737_v26 = vpop.xlane.xlu1 %1736 }
 0x4ab   : > { %v1735_v32 = vpop.xlane.xlu0 %1734  ;;  %v1938_v11 = vadd.f32 %v4135_v2, %v1902_v12  ;;  %v1868_v54 = vmul.f32 %v2924_v47, %v4016_v6  ;;  %2933 = vrsqrt.f32 %v1811_v57  ;;  %v1781_v45 = vmul.f32 0.0078125, %v1737_v26 }
 0x4ac   : > { %1971 = vst [vmem:[%s4144_s13 + $0x48] sm:$0xff] %v1939_v40  ;;  %v1905_v29 = vmul.f32 %v4132_v27, %v1869_v52  ;;  %2935 = vrsqrt.f32 %v1810_v10  ;;  %v1780_v9 = vmul.f32 0.0078125, %v1735_v32 }
 0x4ad   : > { %v2926_v46 = vpop.eup %2925  ;;  %1970 = vst [vmem:[%s4144_s13 + $0x40] sm:$0xff] %v1938_v11  ;;  %v1904_v39 = vmul.f32 %v4132_v27, %v1868_v54  ;;  %v1813_v34 = vadd.f32 1e-05, %v1781_v45 }
 0x4ae   : > { %v2928_v4 = vpop.eup %2927  ;;  %v1941_v38 = vadd.f32 %v4135_v2, %v1905_v29  ;;  %v1871_v30 = vmul.f32 %v2926_v46, %v4033_v22  ;;  %v1812_v6 = vadd.f32 1e-05, %v1780_v9  ;;  %v1741_v48 = vpop.xlane.xlu1 %1740 }
 0x4af   : > { %v1739_v62 = vpop.xlane.xlu0 %1738  ;;  %v1940_v43 = vadd.f32 %v4135_v2, %v1904_v39  ;;  %v1870_v51 = vmul.f32 %v2928_v4, %v4026_v0  ;;  %2937 = vrsqrt.f32 %v1813_v34  ;;  %v1783_v63 = vmul.f32 0.0078125, %v1741_v48 }
 0x4b0   : > { %1973 = vst [vmem:[%s4144_s13 + $0x58] sm:$0xff] %v1941_v38  ;;  %v1907_v21 = vmul.f32 %v4132_v27, %v1871_v30  ;;  %2939 = vrsqrt.f32 %v1812_v6  ;;  %v1782_v61 = vmul.f32 0.0078125, %v1739_v62 }
 0x4b1   : > { %v2930_v17 = vpop.eup %2929  ;;  %1972 = vst [vmem:[%s4144_s13 + $0x50] sm:$0xff] %v1940_v43  ;;  %v1906_v18 = vmul.f32 %v4132_v27, %v1870_v51  ;;  %v1815_v22 = vadd.f32 1e-05, %v1783_v63 }
 0x4b2   : > { %v2932_v59 = vpop.eup %2931  ;;  %v1943_v42 = vadd.f32 %v4135_v2, %v1907_v21  ;;  %v1873_v58 = vmul.f32 %v2930_v17, %v4043_v44  ;;  %v1814_v0 = vadd.f32 1e-05, %v1782_v61  ;;  %v1745_v14 = vpop.xlane.xlu1 %1744 }
 0x4b3   : > { %v1743_v56 = vpop.xlane.xlu0 %1742  ;;  %v1942_v19 = vadd.f32 %v4135_v2, %v1906_v18  ;;  %v1872_v37 = vmul.f32 %v2932_v59, %v4036_v53  ;;  %2941 = vrsqrt.f32 %v1815_v22  ;;  %v1785_v41 = vmul.f32 0.0078125, %v1745_v14 }
 0x4b4   : > { %1975 = vst [vmem:[%s4144_s13 + $0x68] sm:$0xff] %v1943_v42  ;;  %v1909_v23 = vmul.f32 %v4132_v27, %v1873_v58  ;;  %2943 = vrsqrt.f32 %v1814_v0  ;;  %v1784_v55 = vmul.f32 0.0078125, %v1743_v56 }
 0x4b5   : > { %v2934_v31 = vpop.eup %2933  ;;  %1974 = vst [vmem:[%s4144_s13 + $0x60] sm:$0xff] %v1942_v19  ;;  %v1908_v20 = vmul.f32 %v4132_v27, %v1872_v37  ;;  %v1817_v44 = vadd.f32 1e-05, %v1785_v41 }
 0x4b6   : > { %v2936_v50 = vpop.eup %2935  ;;  %v1945_v12 = vadd.f32 %v4135_v2, %v1909_v23  ;;  %v1875_v57 = vmul.f32 %v2934_v31, %v4053_v60  ;;  %v1816_v53 = vadd.f32 1e-05, %v1784_v55  ;;  %v1749_v47 = vpop.xlane.xlu1 %1748 }
 0x4b7   : > { %v1747_v40 = vpop.xlane.xlu0 %1746  ;;  %v1944_v52 = vadd.f32 %v4135_v2, %v1908_v20  ;;  %v1874_v10 = vmul.f32 %v2936_v50, %v4046_v8  ;;  %2945 = vrsqrt.f32 %v1817_v44  ;;  %v1787_v26 = vmul.f32 0.0078125, %v1749_v47 }
 0x4b8   : > { %1977 = vst [vmem:[%s4144_s13 + $0x78] sm:$0xff] %v1945_v12  ;;  %v1911_v32 = vmul.f32 %v4132_v27, %v1875_v57  ;;  %2947 = vrsqrt.f32 %v1816_v53  ;;  %v1786_v11 = vmul.f32 0.0078125, %v1747_v40 }
 0x4b9   : > { %v2938_v54 = vpop.eup %2937  ;;  %1976 = vst [vmem:[%s4144_s13 + $0x70] sm:$0xff] %v1944_v52  ;;  %v1910_v45 = vmul.f32 %v4132_v27, %v1874_v10  ;;  %v1819_v60 = vadd.f32 1e-05, %v1787_v26 }
 0x4ba   : > { %v2940_v29 = vpop.eup %2939  ;;  %v1947_v9 = vadd.f32 %v4135_v2, %v1911_v32  ;;  %v1877_v46 = vmul.f32 %v2938_v54, %v4063_v13  ;;  %v1818_v8 = vadd.f32 1e-05, %v1786_v11  ;;  %v1753_v39 = vpop.xlane.xlu1 %1752 }
 0x4bb   : > { %v1751_v34 = vpop.xlane.xlu0 %1750  ;;  %v1946_v4 = vadd.f32 %v4135_v2, %v1910_v45  ;;  %v1876_v38 = vmul.f32 %v2940_v29, %v4056_v28  ;;  %2949 = vrsqrt.f32 %v1819_v60  ;;  %v1789_v30 = vmul.f32 0.0078125, %v1753_v39 }
 0x4bc   : > { %1979 = vst [vmem:[%s4144_s13 + $0x88] sm:$0xff] %v1947_v9  ;;  %v1913_v6 = vmul.f32 %v4132_v27, %v1877_v46  ;;  %2951 = vrsqrt.f32 %v1818_v8  ;;  %v1788_v48 = vmul.f32 0.0078125, %v1751_v34 }
 0x4bd   : > { %v2942_v62 = vpop.eup %2941  ;;  %1978 = vst [vmem:[%s4144_s13 + $0x80] sm:$0xff] %v1946_v4  ;;  %v1912_v43 = vmul.f32 %v4132_v27, %v1876_v38  ;;  %v1821_v13 = vadd.f32 1e-05, %v1789_v30 }
 0x4be   : > { %v2944_v51 = vpop.eup %2943  ;;  %v1949_v63 = vadd.f32 %v4135_v2, %v1913_v6  ;;  %v1879_v21 = vmul.f32 %v2942_v62, %v4073_v3  ;;  %v1820_v28 = vadd.f32 1e-05, %v1788_v48  ;;  %v1757_v61 = vpop.xlane.xlu1 %1756 }
 0x4bf   : > { %v1755_v17 = vpop.xlane.xlu0 %1754  ;;  %v1948_v18 = vadd.f32 %v4135_v2, %v1912_v43  ;;  %v1878_v22 = vmul.f32 %v2944_v51, %v4066_v25  ;;  %2953 = vrsqrt.f32 %v1821_v13  ;;  %v1791_v59 = vmul.f32 0.0078125, %v1757_v61 }
 0x4c0   : > { %1981 = vst [vmem:[%s4144_s13 + $0x98] sm:$0xff] %v1949_v63  ;;  %v1915_v42 = vmul.f32 %v4132_v27, %v1879_v21  ;;  %2955 = vrsqrt.f32 %v1820_v28  ;;  %v1790_v58 = vmul.f32 0.0078125, %v1755_v17 }
 0x4c1   : > { %v2946_v0 = vpop.eup %2945  ;;  %1980 = vst [vmem:[%s4144_s13 + $0x90] sm:$0xff] %v1948_v18  ;;  %v1914_v14 = vmul.f32 %v4132_v27, %v1878_v22  ;;  %v1823_v3 = vadd.f32 1e-05, %v1791_v59 }
 0x4c2   : > { %v2948_v56 = vpop.eup %2947  ;;  %v1951_v19 = vadd.f32 %v4135_v2, %v1915_v42  ;;  %v1881_v37 = vmul.f32 %v2946_v0, %v4083_v16  ;;  %v1822_v25 = vadd.f32 1e-05, %v1790_v58  ;;  %v1761_v41 = vpop.xlane.xlu1 %1760 }
 0x4c3   : > { %v1759_v23 = vpop.xlane.xlu0 %1758  ;;  %v1950_v55 = vadd.f32 %v4135_v2, %v1914_v14  ;;  %v1880_v31 = vmul.f32 %v2948_v56, %v4076_v7  ;;  %2957 = vrsqrt.f32 %v1823_v3  ;;  %v1793_v20 = vmul.f32 0.0078125, %v1761_v41 }
 0x4c4   : > { %1983 = vst [vmem:[%s4144_s13 + $0xa8] sm:$0xff] %v1951_v19  ;;  %v1917_v44 = vmul.f32 %v4132_v27, %v1881_v37  ;;  %2959 = vrsqrt.f32 %v1822_v25  ;;  %v1792_v50 = vmul.f32 0.0078125, %v1759_v23 }
 0x4c5   : > { %v2950_v12 = vpop.eup %2949  ;;  %1982 = vst [vmem:[%s4144_s13 + $0xa0] sm:$0xff] %v1950_v55  ;;  %v1916_v16 = vmul.f32 %v4132_v27, %v1880_v31  ;;  %v1825_v57 = vadd.f32 1e-05, %v1793_v20 }
 0x4c6   : > { %v2952_v53 = vpop.eup %2951  ;;  %v1953_v47 = vadd.f32 %v4135_v2, %v1917_v44  ;;  %v1883_v40 = vmul.f32 %v2950_v12, %v4093_v33  ;;  %v1824_v7 = vadd.f32 1e-05, %v1792_v50 }
 0x4c7   : > { %v1952_v52 = vadd.f32 %v4135_v2, %v1916_v16  ;;  %v1882_v10 = vmul.f32 %v2952_v53, %v4086_v36  ;;  %2961 = vrsqrt.f32 %v1825_v57 }
 0x4c8   : > { %1985 = vst [vmem:[%s4144_s13 + $0xb8] sm:$0xff] %v1953_v47  ;;  %v1919_v26 = vmul.f32 %v4132_v27, %v1883_v40  ;;  %2963 = vrsqrt.f32 %v1824_v7 }
 0x4c9   : > { %v2954_v32 = vpop.eup %2953  ;;  %1984 = vst [vmem:[%s4144_s13 + $0xb0] sm:$0xff] %v1952_v52  ;;  %v1918_v11 = vmul.f32 %v4132_v27, %v1882_v10 }
 0x4ca   : > { %v2956_v54 = vpop.eup %2955  ;;  %v1955_v33 = vadd.f32 %v4135_v2, %v1919_v26  ;;  %v1885_v45 = vmul.f32 %v2954_v32, %v4103_v35 }
 0x4cb   : > { %v1954_v60 = vadd.f32 %v4135_v2, %v1918_v11  ;;  %v1884_v36 = vmul.f32 %v2956_v54, %v4096_v24 }
 0x4cc   : > { %1987 = vst [vmem:[%s4144_s13 + $0xc8] sm:$0xff] %v1955_v33  ;;  %v1921_v29 = vmul.f32 %v4132_v27, %v1885_v45 }
 0x4cd   : > { %v2958_v9 = vpop.eup %2957  ;;  %1986 = vst [vmem:[%s4144_s13 + $0xc0] sm:$0xff] %v1954_v60  ;;  %v1920_v46 = vmul.f32 %v4132_v27, %v1884_v36 }
 0x4ce   : > { %v2960_v8 = vpop.eup %2959  ;;  %v1957_v39 = vadd.f32 %v4135_v2, %v1921_v29  ;;  %v1887_v35 = vmul.f32 %v2958_v9, %v4113_v49 }
 0x4cf   : > { %v1956_v34 = vadd.f32 %v4135_v2, %v1920_v46  ;;  %v1886_v24 = vmul.f32 %v2960_v8, %v4106_v1 }
 0x4d0   : > { %1989 = vst [vmem:[%s4144_s13 + $0xd8] sm:$0xff] %v1957_v39  ;;  %v1923_v4 = vmul.f32 %v4132_v27, %v1887_v35 }
 0x4d1   : > { %v2962_v38 = vpop.eup %2961  ;;  %1988 = vst [vmem:[%s4144_s13 + $0xd0] sm:$0xff] %v1956_v34  ;;  %v1922_v30 = vmul.f32 %v4132_v27, %v1886_v24 }
 0x4d2   : > { %v2964_v6 = vpop.eup %2963  ;;  %v1959_v48 = vadd.f32 %v4135_v2, %v1923_v4  ;;  %v1889_v49 = vmul.f32 %v2962_v38, %v4123_v5 }
 0x4d3   : > { %v1958_v62 = vadd.f32 %v4135_v2, %v1922_v30  ;;  %v1888_v43 = vmul.f32 %v2964_v6, %v4116_v15 }
 0x4d4   : > { %1991 = vst [vmem:[%s4144_s13 + $0xe8] sm:$0xff] %v1959_v48  ;;  %v1925_v1 = vmul.f32 %v4132_v27, %v1889_v49 }
 0x4d5   : > { %1990 = vst [vmem:[%s4144_s13 + $0xe0] sm:$0xff] %v1958_v62  ;;  %v1924_v13 = vmul.f32 %v4132_v27, %v1888_v43 }
 0x4d6   : > { %v1961_v51 = vadd.f32 %v4135_v2, %v1925_v1 }
 0x4d7   : > { %v1960_v15 = vadd.f32 %v4135_v2, %v1924_v13 }
 0x4d8   : > { %1993 = vst [vmem:[%s4144_s13 + $0xf8] sm:$0xff] %v1961_v51 }
 0x4d9   : > { %1992 = vst [vmem:[%s4144_s13 + $0xf0] sm:$0xff] %v1960_v15 }
 0x4da   : > { %3093 = shalt.err (!%p3090_p4)
}
 0x4db   : > { %s3094_s6 = scalar_lea.hbm %s4271_s15, 4096  ;;  %s3098_s23 = scalar_lea.hbm %s4325_s5, 8192 }
 0x4dc   : > { %p3095_p9 = scmp.ne.s32.totalorder %s4271_s15, %s3094_s6  ;;  %p3099_p8 = scmp.lt.u32.totalorder %s4271_s15, %s4325_s5 }
 0x4dd   : > { %p3100_p13 = scmp.lt.u32.totalorder %s3098_s23, %s3094_s6  ;;  %p3102_p10 = scmp.lt.u32.totalorder %s3094_s6, %s4271_s15 }
 0x4de   : > { %p3096_p0 = pnand %p3095_p9, %p3349_p5 }
 0x4df   : > { %p3101_p6 = por %p3100_p13, %p3099_p8 }
 0x4e0   : > { %p3097_p11 = pneg %p3096_p0 }
 0x4e1   : > { %p3103_p3 = por %p3102_p10, %p3101_p6 }
 0x4e3   : > { %p3104_p7 = pnand %p3103_p3, %p3097_p11 }
 0x4e5   : > { %3107 = shalt.err (!%p3104_p7)
}
 0x4e6   : > { %s3163_s16 = smov 128   ;;  %s3164_s12 = smov 8  }
 0x4e7   : > { %2642 = dma.vmem_to_hbm [thread:$0]  (%p3349_p5), %s4273_s28, 4096, %s4271_s15, %s1995_s22, %s3163_s16, %s3163_s16, %s3164_s12  }
 0x4e8 PF: > { %s2023_s9 = sand.u32 1, %s3142_s18   ;;  %p4343_p12 = scmp.ne.s32.totalorder %s4330_s25, 0 }
 0x4e9   : > { %p4344_p1 = scmp.ge.s32.totalorder %s3154_s21, 2  ;;  %s2024_s17 = scalar_lea.sflag [#allocation4], %s2023_s9 }
 0x4eb   : > { %p2659_p2 = pnand %p4344_p1, %p4343_p12 }
 0x4ed   : > { %3137 = dma.done.wait (!%p2659_p2), %s2024_s17, 4096  }
 0x4ee   : > { %3139 = vsyncadd (!%p2659_p2), %s2024_s17, 4294963200  ;;  %p20_p4 = scmp.ge.s32.totalorder %s3335_s14, 4   ;;  %s4345_s18 = smov %s3146_s19 }
 0x4ef   : > { %s4346_s19 = smov %s3150_s20  ;;  %s4347_s20 = smov %s3345_s30 }
 0x4f0   : > { %s4348_s21 = smov %s3335_s14  ;;  %22 = sbr.rel (!%p20_p4) target bundleno = 7 (0x7), region = 97 }
 0x4f7   :  { %2029 = vsyncpa [#allocation3], 1 }
 0x4f8   :  { %2031 = vsyncpa [#allocation3 + $0x1], 1 }
 0x4f9   :  { %2032 = vsyncpa [#allocation6], 1 }
 0x4fa   :  { %2033 = vsyncpa [#allocation9], 1 }
 0x4fb   :  { %2034 = vsyncpa [#allocation4], 1 }
 0x4fc   :  { %2036 = vsyncpa [#allocation4 + $0x1], 1 }

</bundles_post_ra>
